<compile_context>
chip_gen: v5e
topology: v5e:2x2
jax: 0.10.0
libtpu: 0.0.40
codegen_flags: <defaults>
</compile_context>

<pallas_src>
import jax
import jax.numpy as jnp
from jax.experimental import pallas as pl
from jax.experimental.pallas import tpu as pltpu


_HIDDEN_PAD = 128  # hidden dims 100 -> 128 and 50 -> 128


def _round_up(n, m):
    return (n + m - 1) // m * m


def _ffn_kernel(xr_ref,
                w1_ref, b1_ref, w2_ref, b2_ref,
                w3_ref, b3_ref, w4_ref, b4_ref,
                or_ref, oi_ref,
                s_ref):
    """Four fused complex Linear layers + phase-amplitude ReLUs.

    Each weight is packed as W_stack = [Wr | Wi] of shape (K_pad, 2*D_pad),
    each bias as [br | bi] of shape (1, 2*D_pad).
    """

    def parelu(r, i):
        # tanh(|z|) * z / |z|   (exactly 0 at z == 0); rsqrt + tanh on the EUP.
        c2 = r * r + i * i
        inv = jax.lax.rsqrt(jnp.maximum(c2, 1e-30))
        scale = jnp.tanh(c2 * inv) * inv          # == tanh(sqrt(c2)) / sqrt(c2)
        return r * scale, i * scale

    def fused_clinear(r, i, w_ref, b_ref):
        # Stack [real; imag] into a (2, K) LHS and run ONE matmul against the
        # packed (K, 2*D) RHS; recombine real/imag with two add/subs.
        s_ref[0:1, :] = r
        s_ref[1:2, :] = i
        w = w_ref[...]
        d = w.shape[1] // 2
        p = jnp.dot(s_ref[...], w, preferred_element_type=jnp.float32)  # (2, 2D)
        b = b_ref[...]
        out_r = p[0:1, :d] - p[1:2, d:] + b[:, :d]
        out_i = p[0:1, d:] + p[1:2, :d] + b[:, d:]
        return out_r, out_i

    # Layer 1: imaginary input is identically zero -> single real matmul.
    w1 = w1_ref[...]
    d1 = w1.shape[1] // 2
    p1 = jnp.dot(xr_ref[...], w1, preferred_element_type=jnp.float32)  # (1, 2*D1)
    b1 = b1_ref[...]
    r, i = parelu(p1[:, :d1] + b1[:, :d1], p1[:, d1:] + b1[:, d1:])

    # Layers 2..4: one fused complex matmul each on the (2, 128) stacked LHS.
    r, i = parelu(*fused_clinear(r, i, w2_ref, b2_ref))
    r, i = parelu(*fused_clinear(r, i, w3_ref, b3_ref))
    r, i = parelu(*fused_clinear(r, i, w4_ref, b4_ref))

    or_ref[...] = r
    oi_ref[...] = i


def init_params(key, input_size):
    """Deterministic complex-Linear parameters for layer dims
    input_size -> 100 -> 50 -> 100 -> input_size, stored as (in, out)."""
    dims = [(input_size, 100), (100, 50), (50, 100), (100, input_size)]
    params = []
    for (din, dout) in dims:
        key, k1, k2, k3, k4 = jax.random.split(key, 5)
        scale = 1.0 / jnp.sqrt(jnp.float32(din))
        wr = jax.random.normal(k1, (din, dout), jnp.float32) * scale
        wi = jax.random.normal(k2, (din, dout), jnp.float32) * scale
        br = jax.random.normal(k3, (1, dout), jnp.float32) * 0.1
        bi = jax.random.normal(k4, (1, dout), jnp.float32) * 0.1
        params.append((wr, wi, br, bi))
    return params


def pack_params(params, input_size):
    """Zero-pad every dim to a multiple of 128 and pack each complex layer as
    W_stack = [Wr | Wi]  (K_pad, 2*D_pad)  and  b_stack = [br | bi]  (1, 2*D_pad)."""
    n_pad = _round_up(input_size, 128)
    dims = [(input_size, 100), (100, 50), (50, 100), (100, input_size)]
    pad_dims = [(n_pad, _HIDDEN_PAD), (_HIDDEN_PAD, _HIDDEN_PAD),
                (_HIDDEN_PAD, _HIDDEN_PAD), (_HIDDEN_PAD, n_pad)]
    packed = []
    for (wr, wi, br, bi), (din, dout), (dp_in, dp_out) in zip(params, dims, pad_dims):
        wr_p = jnp.zeros((dp_in, dp_out), jnp.float32).at[:din, :dout].set(wr)
        wi_p = jnp.zeros((dp_in, dp_out), jnp.float32).at[:din, :dout].set(wi)
        br_p = jnp.zeros((1, dp_out), jnp.float32).at[:, :dout].set(br)
        bi_p = jnp.zeros((1, dp_out), jnp.float32).at[:, :dout].set(bi)
        packed.append((jnp.concatenate([wr_p, wi_p], axis=1),
                       jnp.concatenate([br_p, bi_p], axis=1)))
    return packed


def feed_forward_model(x, packed_params):
    """Pallas equivalent of FeedForwardModel.forward."""
    orig_shape = x.shape
    n = x.size
    n_pad = packed_params[0][0].shape[0]           # padded input_size
    out_pad = packed_params[3][0].shape[1] // 2    # padded output size (== n_pad)

    # y = flatten(x); z = y.cfloat()  (imag part is zero -> not materialized)
    xr = jnp.zeros((1, n_pad), jnp.float32).at[:, :n].set(
        jnp.reshape(x.astype(jnp.float32), (1, n)))

    operands = [xr]
    for (w_stack, b_stack) in packed_params:
        operands.append(w_stack)
        operands.append(b_stack)

    def full_spec(arr):
        return pl.BlockSpec(arr.shape, lambda: tuple(0 for _ in arr.shape))

    out_r, out_i = pl.pallas_call(
        _ffn_kernel,
        out_shape=(jax.ShapeDtypeStruct((1, out_pad), jnp.float32),
                   jax.ShapeDtypeStruct((1, out_pad), jnp.float32)),
        grid=(),
        in_specs=[full_spec(a) for a in operands],
        out_specs=(pl.BlockSpec((1, out_pad), lambda: (0, 0)),
                   pl.BlockSpec((1, out_pad), lambda: (0, 0))),
        scratch_shapes=[pltpu.VMEM((2, _HIDDEN_PAD), jnp.float32)],
    )(*operands)

    out = jax.lax.complex(out_r[:, :n], out_i[:, :n])
    return jnp.reshape(out, orig_shape)            # out.view(b)


def _reference(x, params):
    """Pure-JAX complex reference (unpadded params) for verification."""
    z = jnp.reshape(x.astype(jnp.complex64), (-1,))

    def parelu(z):
        c = jnp.abs(z)
        a = jnp.tanh(c)
        c_safe = jnp.where(c > 0, c, 1.0)
        return jnp.where(c > 0, a * z / c_safe, 0.0 + 0.0j)

    for (wr, wi, br, bi) in params:
        w = wr + 1j * wi
        b = (br + 1j * bi)[0]
        z = z @ w + b
        z = parelu(z)
    return jnp.reshape(z, x.shape)


if __name__ == "__main__":
    # Small NCHW-style input; input_size = prod(shape) = 2*4*8*8 = 512
    x_shape = (2, 4, 8, 8)
    input_size = 2 * 4 * 8 * 8

    key = jax.random.PRNGKey(0)
    key, xk = jax.random.split(key)
    x = jax.random.normal(xk, x_shape, jnp.float32)

    params = init_params(key, input_size)
    packed = pack_params(params, input_size)

    # Single XLA program: input pad + pallas kernel + output slice/recombine.
    ffn = jax.jit(feed_forward_model)

    out = ffn(x, packed)
    out = jax.block_until_ready(out)

    ref = _reference(x, params)
    assert out.shape == x_shape and out.dtype == jnp.complex64
    assert jnp.allclose(out, ref, atol=1e-4, rtol=1e-4), "mismatch vs reference"

    print("KERNEL_OK")
</pallas_src>

<mosaic_0001>
module attributes {stable_mosaic.version = 11 : i64} {
  func.func @_ffn_kernel(%arg0: memref<1x512xf32, #tpu.memory_space<vmem>>, %arg1: memref<512x256xf32, #tpu.memory_space<vmem>>, %arg2: memref<1x256xf32, #tpu.memory_space<vmem>>, %arg3: memref<128x256xf32, #tpu.memory_space<vmem>>, %arg4: memref<1x256xf32, #tpu.memory_space<vmem>>, %arg5: memref<128x256xf32, #tpu.memory_space<vmem>>, %arg6: memref<1x256xf32, #tpu.memory_space<vmem>>, %arg7: memref<128x1024xf32, #tpu.memory_space<vmem>>, %arg8: memref<1x1024xf32, #tpu.memory_space<vmem>>, %arg9: memref<1x512xf32, #tpu.memory_space<vmem>>, %arg10: memref<1x512xf32, #tpu.memory_space<vmem>>, %arg11: memref<2x128xf32, #tpu.memory_space<vmem>>) attributes {dimension_semantics = [], scalar_prefetch = 0 : i64, scratch_operands = 1 : i64, tpu.core_type = #tpu.core_type<tc>} {
    %c0 = arith.constant 0 : index
    %c0_0 = arith.constant 0 : index
    %0 = vector.load %arg1[%c0, %c0_0] : memref<512x256xf32, #tpu.memory_space<vmem>>, vector<512x256xf32>
    %c0_1 = arith.constant 0 : index
    %c0_2 = arith.constant 0 : index
    %1 = vector.load %arg0[%c0_1, %c0_2] : memref<1x512xf32, #tpu.memory_space<vmem>>, vector<1x512xf32>
    %cst = arith.constant dense<0.000000e+00> : vector<1x256xf32>
    %2 = tpu.matmul %1, %0, %cst {dimension_numbers = #tpu.dot_dimension_numbers<[1], [0], [0], [1], [0, 0, 1, 1], [], []>} : vector<1x512xf32>, vector<512x256xf32>, vector<1x256xf32> -> vector<1x256xf32>
    %c0_3 = arith.constant 0 : index
    %c0_4 = arith.constant 0 : index
    %3 = vector.load %arg2[%c0_3, %c0_4] : memref<1x256xf32, #tpu.memory_space<vmem>>, vector<1x256xf32>
    %4 = vector.extract_strided_slice %2 {offsets = [0, 0], sizes = [1, 128], strides = [1, 1]} : vector<1x256xf32> to vector<1x128xf32>
    %5 = vector.extract_strided_slice %3 {offsets = [0, 0], sizes = [1, 128], strides = [1, 1]} : vector<1x256xf32> to vector<1x128xf32>
    %6 = arith.addf %4, %5 : vector<1x128xf32>
    %7 = vector.extract_strided_slice %2 {offsets = [0, 128], sizes = [1, 128], strides = [1, 1]} : vector<1x256xf32> to vector<1x128xf32>
    %8 = vector.extract_strided_slice %3 {offsets = [0, 128], sizes = [1, 128], strides = [1, 1]} : vector<1x256xf32> to vector<1x128xf32>
    %9 = arith.addf %7, %8 : vector<1x128xf32>
    %10 = arith.mulf %6, %6 : vector<1x128xf32>
    %11 = arith.mulf %9, %9 : vector<1x128xf32>
    %12 = arith.addf %10, %11 : vector<1x128xf32>
    %cst_5 = arith.constant 1.000000e-30 : f32
    %13 = vector.broadcast %cst_5 : f32 to vector<1x128xf32>
    %14 = arith.maximumf %12, %13 : vector<1x128xf32>
    %15 = math.rsqrt %14 : vector<1x128xf32>
    %16 = arith.mulf %12, %15 : vector<1x128xf32>
    %17 = math.tanh %16 : vector<1x128xf32>
    %18 = arith.mulf %17, %15 : vector<1x128xf32>
    %19 = arith.mulf %6, %18 : vector<1x128xf32>
    %20 = arith.mulf %9, %18 : vector<1x128xf32>
    %c0_6 = arith.constant 0 : index
    %c0_7 = arith.constant 0 : index
    %21 = vector.load %arg11[%c0_6, %c0_7] : memref<2x128xf32, #tpu.memory_space<vmem>>, vector<1x128xf32>
    tpu.vector_store %arg11[%c0_6, %c0_7], %19 {strides = array<i32>} : memref<2x128xf32, #tpu.memory_space<vmem>>, vector<1x128xf32>,
    %c1 = arith.constant 1 : index
    %c0_8 = arith.constant 0 : index
    %22 = vector.load %arg11[%c1, %c0_8] : memref<2x128xf32, #tpu.memory_space<vmem>>, vector<1x128xf32>
    tpu.vector_store %arg11[%c1, %c0_8], %20 {strides = array<i32>} : memref<2x128xf32, #tpu.memory_space<vmem>>, vector<1x128xf32>,
    %c0_9 = arith.constant 0 : index
    %c0_10 = arith.constant 0 : index
    %23 = vector.load %arg3[%c0_9, %c0_10] : memref<128x256xf32, #tpu.memory_space<vmem>>, vector<128x256xf32>
    %c0_11 = arith.constant 0 : index
    %c0_12 = arith.constant 0 : index
    %24 = vector.load %arg11[%c0_11, %c0_12] : memref<2x128xf32, #tpu.memory_space<vmem>>, vector<2x128xf32>
    %cst_13 = arith.constant dense<0.000000e+00> : vector<2x256xf32>
    %25 = tpu.matmul %24, %23, %cst_13 {dimension_numbers = #tpu.dot_dimension_numbers<[1], [0], [0], [1], [0, 0, 1, 1], [], []>} : vector<2x128xf32>, vector<128x256xf32>, vector<2x256xf32> -> vector<2x256xf32>
    %c0_14 = arith.constant 0 : index
    %c0_15 = arith.constant 0 : index
    %26 = vector.load %arg4[%c0_14, %c0_15] : memref<1x256xf32, #tpu.memory_space<vmem>>, vector<1x256xf32>
    %27 = vector.extract_strided_slice %25 {offsets = [0, 0], sizes = [1, 128], strides = [1, 1]} : vector<2x256xf32> to vector<1x128xf32>
    %28 = vector.extract_strided_slice %25 {offsets = [1, 128], sizes = [1, 128], strides = [1, 1]} : vector<2x256xf32> to vector<1x128xf32>
    %29 = arith.subf %27, %28 : vector<1x128xf32>
    %30 = vector.extract_strided_slice %26 {offsets = [0, 0], sizes = [1, 128], strides = [1, 1]} : vector<1x256xf32> to vector<1x128xf32>
    %31 = arith.addf %29, %30 : vector<1x128xf32>
    %32 = vector.extract_strided_slice %25 {offsets = [0, 128], sizes = [1, 128], strides = [1, 1]} : vector<2x256xf32> to vector<1x128xf32>
    %33 = vector.extract_strided_slice %25 {offsets = [1, 0], sizes = [1, 128], strides = [1, 1]} : vector<2x256xf32> to vector<1x128xf32>
    %34 = arith.addf %32, %33 : vector<1x128xf32>
    %35 = vector.extract_strided_slice %26 {offsets = [0, 128], sizes = [1, 128], strides = [1, 1]} : vector<1x256xf32> to vector<1x128xf32>
    %36 = arith.addf %34, %35 : vector<1x128xf32>
    %37 = arith.mulf %31, %31 : vector<1x128xf32>
    %38 = arith.mulf %36, %36 : vector<1x128xf32>
    %39 = arith.addf %37, %38 : vector<1x128xf32>
    %cst_16 = arith.constant 1.000000e-30 : f32
    %40 = vector.broadcast %cst_16 : f32 to vector<1x128xf32>
    %41 = arith.maximumf %39, %40 : vector<1x128xf32>
    %42 = math.rsqrt %41 : vector<1x128xf32>
    %43 = arith.mulf %39, %42 : vector<1x128xf32>
    %44 = math.tanh %43 : vector<1x128xf32>
    %45 = arith.mulf %44, %42 : vector<1x128xf32>
    %46 = arith.mulf %31, %45 : vector<1x128xf32>
    %47 = arith.mulf %36, %45 : vector<1x128xf32>
    %c0_17 = arith.constant 0 : index
    %c0_18 = arith.constant 0 : index
    %48 = vector.load %arg11[%c0_17, %c0_18] : memref<2x128xf32, #tpu.memory_space<vmem>>, vector<1x128xf32>
    tpu.vector_store %arg11[%c0_17, %c0_18], %46 {strides = array<i32>} : memref<2x128xf32, #tpu.memory_space<vmem>>, vector<1x128xf32>,
    %c1_19 = arith.constant 1 : index
    %c0_20 = arith.constant 0 : index
    %49 = vector.load %arg11[%c1_19, %c0_20] : memref<2x128xf32, #tpu.memory_space<vmem>>, vector<1x128xf32>
    tpu.vector_store %arg11[%c1_19, %c0_20], %47 {strides = array<i32>} : memref<2x128xf32, #tpu.memory_space<vmem>>, vector<1x128xf32>,
    %c0_21 = arith.constant 0 : index
    %c0_22 = arith.constant 0 : index
    %50 = vector.load %arg5[%c0_21, %c0_22] : memref<128x256xf32, #tpu.memory_space<vmem>>, vector<128x256xf32>
    %c0_23 = arith.constant 0 : index
    %c0_24 = arith.constant 0 : index
    %51 = vector.load %arg11[%c0_23, %c0_24] : memref<2x128xf32, #tpu.memory_space<vmem>>, vector<2x128xf32>
    %cst_25 = arith.constant dense<0.000000e+00> : vector<2x256xf32>
    %52 = tpu.matmul %51, %50, %cst_25 {dimension_numbers = #tpu.dot_dimension_numbers<[1], [0], [0], [1], [0, 0, 1, 1], [], []>} : vector<2x128xf32>, vector<128x256xf32>, vector<2x256xf32> -> vector<2x256xf32>
    %c0_26 = arith.constant 0 : index
    %c0_27 = arith.constant 0 : index
    %53 = vector.load %arg6[%c0_26, %c0_27] : memref<1x256xf32, #tpu.memory_space<vmem>>, vector<1x256xf32>
    %54 = vector.extract_strided_slice %52 {offsets = [0, 0], sizes = [1, 128], strides = [1, 1]} : vector<2x256xf32> to vector<1x128xf32>
    %55 = vector.extract_strided_slice %52 {offsets = [1, 128], sizes = [1, 128], strides = [1, 1]} : vector<2x256xf32> to vector<1x128xf32>
    %56 = arith.subf %54, %55 : vector<1x128xf32>
    %57 = vector.extract_strided_slice %53 {offsets = [0, 0], sizes = [1, 128], strides = [1, 1]} : vector<1x256xf32> to vector<1x128xf32>
    %58 = arith.addf %56, %57 : vector<1x128xf32>
    %59 = vector.extract_strided_slice %52 {offsets = [0, 128], sizes = [1, 128], strides = [1, 1]} : vector<2x256xf32> to vector<1x128xf32>
    %60 = vector.extract_strided_slice %52 {offsets = [1, 0], sizes = [1, 128], strides = [1, 1]} : vector<2x256xf32> to vector<1x128xf32>
    %61 = arith.addf %59, %60 : vector<1x128xf32>
    %62 = vector.extract_strided_slice %53 {offsets = [0, 128], sizes = [1, 128], strides = [1, 1]} : vector<1x256xf32> to vector<1x128xf32>
    %63 = arith.addf %61, %62 : vector<1x128xf32>
    %64 = arith.mulf %58, %58 : vector<1x128xf32>
    %65 = arith.mulf %63, %63 : vector<1x128xf32>
    %66 = arith.addf %64, %65 : vector<1x128xf32>
    %cst_28 = arith.constant 1.000000e-30 : f32
    %67 = vector.broadcast %cst_28 : f32 to vector<1x128xf32>
    %68 = arith.maximumf %66, %67 : vector<1x128xf32>
    %69 = math.rsqrt %68 : vector<1x128xf32>
    %70 = arith.mulf %66, %69 : vector<1x128xf32>
    %71 = math.tanh %70 : vector<1x128xf32>
    %72 = arith.mulf %71, %69 : vector<1x128xf32>
    %73 = arith.mulf %58, %72 : vector<1x128xf32>
    %74 = arith.mulf %63, %72 : vector<1x128xf32>
    %c0_29 = arith.constant 0 : index
    %c0_30 = arith.constant 0 : index
    %75 = vector.load %arg11[%c0_29, %c0_30] : memref<2x128xf32, #tpu.memory_space<vmem>>, vector<1x128xf32>
    tpu.vector_store %arg11[%c0_29, %c0_30], %73 {strides = array<i32>} : memref<2x128xf32, #tpu.memory_space<vmem>>, vector<1x128xf32>,
    %c1_31 = arith.constant 1 : index
    %c0_32 = arith.constant 0 : index
    %76 = vector.load %arg11[%c1_31, %c0_32] : memref<2x128xf32, #tpu.memory_space<vmem>>, vector<1x128xf32>
    tpu.vector_store %arg11[%c1_31, %c0_32], %74 {strides = array<i32>} : memref<2x128xf32, #tpu.memory_space<vmem>>, vector<1x128xf32>,
    %c0_33 = arith.constant 0 : index
    %c0_34 = arith.constant 0 : index
    %77 = vector.load %arg7[%c0_33, %c0_34] : memref<128x1024xf32, #tpu.memory_space<vmem>>, vector<128x1024xf32>
    %c0_35 = arith.constant 0 : index
    %c0_36 = arith.constant 0 : index
    %78 = vector.load %arg11[%c0_35, %c0_36] : memref<2x128xf32, #tpu.memory_space<vmem>>, vector<2x128xf32>
    %cst_37 = arith.constant dense<0.000000e+00> : vector<2x1024xf32>
    %79 = tpu.matmul %78, %77, %cst_37 {dimension_numbers = #tpu.dot_dimension_numbers<[1], [0], [0], [1], [0, 0, 1, 1], [], []>} : vector<2x128xf32>, vector<128x1024xf32>, vector<2x1024xf32> -> vector<2x1024xf32>
    %c0_38 = arith.constant 0 : index
    %c0_39 = arith.constant 0 : index
    %80 = vector.load %arg8[%c0_38, %c0_39] : memref<1x1024xf32, #tpu.memory_space<vmem>>, vector<1x1024xf32>
    %81 = vector.extract_strided_slice %79 {offsets = [0, 0], sizes = [1, 512], strides = [1, 1]} : vector<2x1024xf32> to vector<1x512xf32>
    %82 = vector.extract_strided_slice %79 {offsets = [1, 512], sizes = [1, 512], strides = [1, 1]} : vector<2x1024xf32> to vector<1x512xf32>
    %83 = arith.subf %81, %82 : vector<1x512xf32>
    %84 = vector.extract_strided_slice %80 {offsets = [0, 0], sizes = [1, 512], strides = [1, 1]} : vector<1x1024xf32> to vector<1x512xf32>
    %85 = arith.addf %83, %84 : vector<1x512xf32>
    %86 = vector.extract_strided_slice %79 {offsets = [0, 512], sizes = [1, 512], strides = [1, 1]} : vector<2x1024xf32> to vector<1x512xf32>
    %87 = vector.extract_strided_slice %79 {offsets = [1, 0], sizes = [1, 512], strides = [1, 1]} : vector<2x1024xf32> to vector<1x512xf32>
    %88 = arith.addf %86, %87 : vector<1x512xf32>
    %89 = vector.extract_strided_slice %80 {offsets = [0, 512], sizes = [1, 512], strides = [1, 1]} : vector<1x1024xf32> to vector<1x512xf32>
    %90 = arith.addf %88, %89 : vector<1x512xf32>
    %91 = arith.mulf %85, %85 : vector<1x512xf32>
    %92 = arith.mulf %90, %90 : vector<1x512xf32>
    %93 = arith.addf %91, %92 : vector<1x512xf32>
    %cst_40 = arith.constant 1.000000e-30 : f32
    %94 = vector.broadcast %cst_40 : f32 to vector<1x512xf32>
    %95 = arith.maximumf %93, %94 : vector<1x512xf32>
    %96 = math.rsqrt %95 : vector<1x512xf32>
    %97 = arith.mulf %93, %96 : vector<1x512xf32>
    %98 = math.tanh %97 : vector<1x512xf32>
    %99 = arith.mulf %98, %96 : vector<1x512xf32>
    %100 = arith.mulf %85, %99 : vector<1x512xf32>
    %101 = arith.mulf %90, %99 : vector<1x512xf32>
    %c0_41 = arith.constant 0 : index
    %c0_42 = arith.constant 0 : index
    %102 = vector.load %arg9[%c0_41, %c0_42] : memref<1x512xf32, #tpu.memory_space<vmem>>, vector<1x512xf32>
    tpu.vector_store %arg9[%c0_41, %c0_42], %100 {strides = array<i32>} : memref<1x512xf32, #tpu.memory_space<vmem>>, vector<1x512xf32>,
    %c0_43 = arith.constant 0 : index
    %c0_44 = arith.constant 0 : index
    %103 = vector.load %arg10[%c0_43, %c0_44] : memref<1x512xf32, #tpu.memory_space<vmem>>, vector<1x512xf32>
    tpu.vector_store %arg10[%c0_43, %c0_44], %101 {strides = array<i32>} : memref<1x512xf32, #tpu.memory_space<vmem>>, vector<1x512xf32>,
    return
  }
}

</mosaic_0001>

<bundles_post_ra>
// kernel: custom-call
= control target key start
LH: loop header
LB: loop body
LE: loop exit
PB: predicated region body
PF: predicated region fallthrough
CT: control target
= control target key end

     0   :  { %s105_s0 = inlined_call_operand.vmem [shape: f32[2,4,8,8], index: 0, kind: input, shape index: {}]   ;;  %s106_s1 = inlined_call_operand.vmem [shape: f32[2,4,8,8], index: 1, kind: input, shape index: {}]   ;;  %s107_s2 = inlined_call_operand.hbm [shape: c64[2,4,8,8], index: 2, kind: output, shape index: {}]  }
   0x1   :  { %s3_s11 = scalar_lea.hbm %s107_s2, 64 }
   0x2   :  { %4 = vsyncpa [#allocation0], 0  ;;  %s6_s14 = sshll.u32 %s105_s0, 4  ;;  %s8_s17 = sshll.u32 %s107_s2, 4  ;;  %s7_s14 = int_to_ptr.vmem [resolvable:$true] %s6_s14  ;;  %s9_s17 = int_to_ptr.hbm [resolvable:$true] %s8_s17 }
   0x3   :  { %11 = dma.vmem_to_hbm [thread:$0]  %s7_s14, 1024, %s9_s17, [#allocation0] }
   0x4   :  { %74 = dma.done.wait [#allocation0], 1024  }
   0x5   :  { %75 = vsyncadd [#allocation0], 4294966272 }
   0x6   :  { %14 = vsyncpa [#allocation0], 1 }
   0x7   :  { %15 = vsyncpa [#allocation1], 0  ;;  %s17_s20 = sshll.u32 %s106_s1, 4  ;;  %s19_s21 = sshll.u32 %s3_s11, 4  ;;  %s18_s20 = int_to_ptr.vmem [resolvable:$true] %s17_s20  ;;  %s20_s21 = int_to_ptr.hbm [resolvable:$true] %s19_s21 }
   0x8   :  { %22 = dma.vmem_to_hbm [thread:$0]  %s18_s20, 1024, %s20_s21, [#allocation1] }
   0x9   :  { %76 = dma.done.wait [#allocation1], 1024  }
   0xa   :  { %77 = vsyncadd [#allocation1], 4294966272 }
   0xb   :  { %25 = vsyncpa [#allocation1], 1 }

// kernel: feed_forward_model.1
= control target key start
LH: loop header
LB: loop body
LE: loop exit
PB: predicated region body
PF: predicated region fallthrough
CT: control target
= control target key end

     0   :  { %16 = vsyncpa [#allocation4], 0  ;;  %s1404_s0 = inlined_call_operand.vmem [shape: f32[1,512], index: 0, kind: input, shape index: {}]   ;;  %s1405_s1 = inlined_call_operand.hbm [shape: f32[512,256], index: 1, kind: input, shape index: {}]   ;;  %s1406_s2 = inlined_call_operand.vmem [shape: f32[1,256], index: 2, kind: input, shape index: {}]   ;;  %s1407_s3 = inlined_call_operand.hbm [shape: f32[128,256], index: 3, kind: input, shape index: {}]   ;;  %s1408_s4 = inlined_call_operand.vmem [shape: f32[1,256], index: 4, kind: input, shape index: {}]   ;;  %s1409_s5 = inlined_call_operand.hbm [shape: f32[128,256], index: 5, kind: input, shape index: {}]   ;;  %s1410_s6 = inlined_call_operand.vmem [shape: f32[1,256], index: 6, kind: input, shape index: {}]   ;;  %s1411_s7 = inlined_call_operand.hbm [shape: f32[128,1024], index: 7, kind: input, shape index: {}]   ;;  %s1412_s8 = inlined_call_operand.vmem [shape: f32[1,1024], index: 8, kind: input, shape index: {}]   ;;  %s1413_s9 = inlined_call_operand.vmem [shape: f32[1,512], index: 9, kind: output, shape index: {0}]   ;;  %s1414_s10 = inlined_call_operand.vmem [shape: f32[1,512], index: 10, kind: output, shape index: {1}]  }
   0x1   :  { %17 = vsyncpa [#allocation6], 0 }
   0x2   :  { %18 = vsyncpa [#allocation9], 0  ;;  %s40_s15 = sshll.u32 %s1407_s3, 4  ;;  %s1241_s16 = smov [#allocation5]   ;;  %s41_s15 = int_to_ptr.hbm [resolvable:$true] %s40_s15 }
   0x3   :  { %s42_s17 = sshll.u32 %s1241_s16, 4  ;;  %s25_s20 = sshll.u32 %s1405_s1, 4  ;;  %s43_s17 = int_to_ptr.vmem [resolvable:$true] %s42_s17  ;;  %s26_s20 = int_to_ptr.hbm [resolvable:$true] %s25_s20 }
   0x4   :  { %s1242_s21 = smov 256   ;;  %s1243_s22 = smov 16  }
   0x5   :  { %48 = dma.hbm_to_vmem [thread:$0]  %s41_s15, 4096, %s43_s17, [#allocation6], %s1242_s21, %s1242_s21, %s1243_s22  }
   0x6   :  { %s1244_s23 = smov [#allocation3]   ;;  %s55_s27 = sshll.u32 %s1409_s5, 4  ;;  %s56_s27 = int_to_ptr.hbm [resolvable:$true] %s55_s27 }
   0x7   :  { %s27_s24 = sshll.u32 %s1244_s23, 4  ;;  %s70_s29 = sshll.u32 %s1411_s7, 4  ;;  %s28_s24 = int_to_ptr.vmem [resolvable:$true] %s27_s24  ;;  %s71_s29 = int_to_ptr.hbm [resolvable:$true] %s70_s29 }
   0x8   :  { %33 = dma.hbm_to_vmem [thread:$0]  %s26_s20, 16384, %s28_s24, [#allocation4], %s1242_s21, %s1242_s21, %s1243_s22  }
   0x9   :  { %s1245_s30 = smov [#allocation7]   ;;  %s1246_s1 = smov [#allocation8]  }
   0xa   :  { %s57_s11 = sshll.u32 %s1245_s30, 4  ;;  %s72_s12 = sshll.u32 %s1246_s1, 4  ;;  %s58_s11 = int_to_ptr.vmem [resolvable:$true] %s57_s11  ;;  %s73_s12 = int_to_ptr.vmem [resolvable:$true] %s72_s12 }
   0xb   :  { %63 = dma.hbm_to_vmem [thread:$0]  %s56_s27, 4096, %s58_s11, [#allocation6], %s1242_s21, %s1242_s21, %s1243_s22  }
   0xc   :  { %s1247_s13 = smov 1024   ;;  %s1248_s14 = smov 64  }
   0xd   :  { %78 = dma.hbm_to_vmem [thread:$0]  %s71_s29, 16384, %s73_s12, [#allocation9], %s1247_s13, %s1247_s13, %s1248_s14  }
   0xe   :  { %1235 = dma.done.wait [#allocation4], 16384  }
   0xf   :  { %1236 = vsyncadd [#allocation4], 4294950912 }
  0x10   :  { %1237 = dma.done.wait [#allocation6], 8192  }
  0x11   :  { %1238 = vsyncadd [#allocation6], 4294959104 }
  0x12   :  { %1239 = dma.done.wait [#allocation9], 16384  }
  0x13   :  { %1240 = vsyncadd [#allocation9], 4294950912  ;;  %v191_v0 = vld [vmem:[#allocation3 + $0x2f0] sm:$0xff]  ;;  %v189_v1 = vld [vmem:[#allocation3 + $0x2e0] sm:$0xff] }
  0x14   :  { %v223_v2 = vld [vmem:[#allocation3 + $0x3f0] sm:$0xff]  ;;  %275 = vmatpush.msra.mxu2 %v191_v0  ;;  %v221_v6 = vld [vmem:[#allocation3 + $0x3e0] sm:$0xff]  ;;  %v192_v62 = vld [vmem:[#allocation3 + $0x2f8] sm:$0xff] }
  0x15   :  { %295 = vmatpush.msra.mxu3 %v223_v2  ;;  %v127_v3 = vld [vmem:[#allocation3 + $0xf0] sm:$0xff]  ;;  %v125_v7 = vld [vmem:[#allocation3 + $0xe0] sm:$0xff]  ;;  %v224_v63 = vld [vmem:[#allocation3 + $0x3f8] sm:$0xff] }
  0x16   :  { %v159_v4 = vld [vmem:[#allocation3 + $0x1f0] sm:$0xff]  ;;  %235 = vmatpush.msra.mxu0 %v127_v3  ;;  %v157_v8 = vld [vmem:[#allocation3 + $0x1e0] sm:$0xff]  ;;  %276 = vmatpush.msra.mxu2 %v189_v1  ;;  %v190_v2 = vld [vmem:[#allocation3 + $0x2e8] sm:$0xff] }
  0x17   :  { %v187_v5 = vld [vmem:[#allocation3 + $0x2d0] sm:$0xff]  ;;  %255 = vmatpush.msra.mxu1 %v159_v4  ;;  %296 = vmatpush.msra.mxu3 %v221_v6  ;;  %v185_v11 = vld [vmem:[#allocation3 + $0x2c0] sm:$0xff]  ;;  %v128_v3 = vld [vmem:[#allocation3 + $0xf8] sm:$0xff] }
  0x18   :  { %v219_v9 = vld [vmem:[#allocation3 + $0x3d0] sm:$0xff]  ;;  %236 = vmatpush.msra.mxu0 %v125_v7  ;;  %v217_v13 = vld [vmem:[#allocation3 + $0x3c0] sm:$0xff]  ;;  %277 = vmatpush.msra.mxu2 %v187_v5  ;;  %v160_v4 = vld [vmem:[#allocation3 + $0x1f8] sm:$0xff] }
  0x19   :  { %v123_v10 = vld [vmem:[#allocation3 + $0xd0] sm:$0xff]  ;;  %256 = vmatpush.msra.mxu1 %v157_v8  ;;  %297 = vmatpush.msra.mxu3 %v219_v9  ;;  %v121_v14 = vld [vmem:[#allocation3 + $0xc0] sm:$0xff]  ;;  %v222_v5 = vld [vmem:[#allocation3 + $0x3e8] sm:$0xff] }
  0x1a   :  { %v155_v12 = vld [vmem:[#allocation3 + $0x1d0] sm:$0xff]  ;;  %v153_v15 = vld [vmem:[#allocation3 + $0x1c0] sm:$0xff]  ;;  %237 = vmatpush.msra.mxu0 %v123_v10  ;;  %278 = vmatpush.msra.mxu2 %v185_v11  ;;  %v188_v6 = vld [vmem:[#allocation3 + $0x2d8] sm:$0xff] }
  0x1b   :  { %257 = vmatpush.msra.mxu1 %v155_v12  ;;  %v183_v16 = vld [vmem:[#allocation3 + $0x2b0] sm:$0xff]  ;;  %298 = vmatpush.msra.mxu3 %v217_v13  ;;  %v181_v20 = vld [vmem:[#allocation3 + $0x2a0] sm:$0xff]  ;;  %v126_v7 = vld [vmem:[#allocation3 + $0xe8] sm:$0xff] }
  0x1c   :  { %v215_v17 = vld [vmem:[#allocation3 + $0x3b0] sm:$0xff]  ;;  %238 = vmatpush.msra.mxu0 %v121_v14  ;;  %v213_v21 = vld [vmem:[#allocation3 + $0x3a0] sm:$0xff]  ;;  %279 = vmatpush.msra.mxu2 %v183_v16  ;;  %v158_v8 = vld [vmem:[#allocation3 + $0x1e8] sm:$0xff] }
  0x1d   :  { %v119_v18 = vld [vmem:[#allocation3 + $0xb0] sm:$0xff]  ;;  %258 = vmatpush.msra.mxu1 %v153_v15  ;;  %299 = vmatpush.msra.mxu3 %v215_v17  ;;  %v117_v22 = vld [vmem:[#allocation3 + $0xa0] sm:$0xff]  ;;  %v220_v9 = vld [vmem:[#allocation3 + $0x3d8] sm:$0xff] }
  0x1e   :  { %v151_v19 = vld [vmem:[#allocation3 + $0x1b0] sm:$0xff]  ;;  %v149_v23 = vld [vmem:[#allocation3 + $0x1a0] sm:$0xff]  ;;  %239 = vmatpush.msra.mxu0 %v119_v18  ;;  %280 = vmatpush.msra.mxu2 %v181_v20  ;;  %v186_v10 = vld [vmem:[#allocation3 + $0x2c8] sm:$0xff] }
  0x1f   :  { %259 = vmatpush.msra.mxu1 %v151_v19  ;;  %v179_v24 = vld [vmem:[#allocation3 + $0x290] sm:$0xff]  ;;  %300 = vmatpush.msra.mxu3 %v213_v21  ;;  %v177_v28 = vld [vmem:[#allocation3 + $0x280] sm:$0xff]  ;;  %v124_v11 = vld [vmem:[#allocation3 + $0xd8] sm:$0xff] }
  0x20   :  { %v211_v25 = vld [vmem:[#allocation3 + $0x390] sm:$0xff]  ;;  %240 = vmatpush.msra.mxu0 %v117_v22  ;;  %v209_v29 = vld [vmem:[#allocation3 + $0x380] sm:$0xff]  ;;  %281 = vmatpush.msra.mxu2 %v179_v24  ;;  %v156_v12 = vld [vmem:[#allocation3 + $0x1d8] sm:$0xff] }
  0x21   :  { %v115_v26 = vld [vmem:[#allocation3 + $0x90] sm:$0xff]  ;;  %260 = vmatpush.msra.mxu1 %v149_v23  ;;  %301 = vmatpush.msra.mxu3 %v211_v25  ;;  %v113_v30 = vld [vmem:[#allocation3 + $0x80] sm:$0xff]  ;;  %v218_v13 = vld [vmem:[#allocation3 + $0x3c8] sm:$0xff] }
  0x22   :  { %v147_v27 = vld [vmem:[#allocation3 + $0x190] sm:$0xff]  ;;  %v145_v31 = vld [vmem:[#allocation3 + $0x180] sm:$0xff]  ;;  %241 = vmatpush.msra.mxu0 %v115_v26  ;;  %282 = vmatpush.msra.mxu2 %v177_v28  ;;  %v184_v14 = vld [vmem:[#allocation3 + $0x2b8] sm:$0xff] }
  0x23   :  { %261 = vmatpush.msra.mxu1 %v147_v27  ;;  %v175_v32 = vld [vmem:[#allocation3 + $0x270] sm:$0xff]  ;;  %302 = vmatpush.msra.mxu3 %v209_v29  ;;  %v173_v36 = vld [vmem:[#allocation3 + $0x260] sm:$0xff]  ;;  %v122_v15 = vld [vmem:[#allocation3 + $0xc8] sm:$0xff] }
  0x24   :  { %v207_v33 = vld [vmem:[#allocation3 + $0x370] sm:$0xff]  ;;  %242 = vmatpush.msra.mxu0 %v113_v30  ;;  %v205_v37 = vld [vmem:[#allocation3 + $0x360] sm:$0xff]  ;;  %283 = vmatpush.msra.mxu2 %v175_v32  ;;  %v154_v16 = vld [vmem:[#allocation3 + $0x1c8] sm:$0xff] }
  0x25   :  { %v111_v34 = vld [vmem:[#allocation3 + $0x70] sm:$0xff]  ;;  %262 = vmatpush.msra.mxu1 %v145_v31  ;;  %303 = vmatpush.msra.mxu3 %v207_v33  ;;  %v109_v38 = vld [vmem:[#allocation3 + $0x60] sm:$0xff]  ;;  %v216_v17 = vld [vmem:[#allocation3 + $0x3b8] sm:$0xff] }
  0x26   :  { %v143_v35 = vld [vmem:[#allocation3 + $0x170] sm:$0xff]  ;;  %v141_v39 = vld [vmem:[#allocation3 + $0x160] sm:$0xff]  ;;  %243 = vmatpush.msra.mxu0 %v111_v34  ;;  %284 = vmatpush.msra.mxu2 %v173_v36  ;;  %v182_v18 = vld [vmem:[#allocation3 + $0x2a8] sm:$0xff] }
  0x27   :  { %263 = vmatpush.msra.mxu1 %v143_v35  ;;  %v171_v40 = vld [vmem:[#allocation3 + $0x250] sm:$0xff]  ;;  %304 = vmatpush.msra.mxu3 %v205_v37  ;;  %v169_v44 = vld [vmem:[#allocation3 + $0x240] sm:$0xff]  ;;  %v120_v19 = vld [vmem:[#allocation3 + $0xb8] sm:$0xff] }
  0x28   :  { %v203_v41 = vld [vmem:[#allocation3 + $0x350] sm:$0xff]  ;;  %244 = vmatpush.msra.mxu0 %v109_v38  ;;  %v201_v45 = vld [vmem:[#allocation3 + $0x340] sm:$0xff]  ;;  %285 = vmatpush.msra.mxu2 %v171_v40  ;;  %v152_v20 = vld [vmem:[#allocation3 + $0x1b8] sm:$0xff] }
  0x29   :  { %v107_v42 = vld [vmem:[#allocation3 + $0x50] sm:$0xff]  ;;  %264 = vmatpush.msra.mxu1 %v141_v39  ;;  %305 = vmatpush.msra.mxu3 %v203_v41  ;;  %v105_v46 = vld [vmem:[#allocation3 + $0x40] sm:$0xff]  ;;  %v214_v21 = vld [vmem:[#allocation3 + $0x3a8] sm:$0xff] }
  0x2a   :  { %v139_v43 = vld [vmem:[#allocation3 + $0x150] sm:$0xff]  ;;  %v137_v47 = vld [vmem:[#allocation3 + $0x140] sm:$0xff]  ;;  %245 = vmatpush.msra.mxu0 %v107_v42  ;;  %286 = vmatpush.msra.mxu2 %v169_v44  ;;  %v180_v22 = vld [vmem:[#allocation3 + $0x298] sm:$0xff] }
  0x2b   :  { %265 = vmatpush.msra.mxu1 %v139_v43  ;;  %v167_v48 = vld [vmem:[#allocation3 + $0x230] sm:$0xff]  ;;  %306 = vmatpush.msra.mxu3 %v201_v45  ;;  %v165_v52 = vld [vmem:[#allocation3 + $0x220] sm:$0xff]  ;;  %v118_v23 = vld [vmem:[#allocation3 + $0xa8] sm:$0xff] }
  0x2c   :  { %v199_v49 = vld [vmem:[#allocation3 + $0x330] sm:$0xff]  ;;  %246 = vmatpush.msra.mxu0 %v105_v46  ;;  %v197_v53 = vld [vmem:[#allocation3 + $0x320] sm:$0xff]  ;;  %287 = vmatpush.msra.mxu2 %v167_v48  ;;  %v150_v24 = vld [vmem:[#allocation3 + $0x1a8] sm:$0xff] }
  0x2d   :  { %v103_v50 = vld [vmem:[#allocation3 + $0x30] sm:$0xff]  ;;  %266 = vmatpush.msra.mxu1 %v137_v47  ;;  %307 = vmatpush.msra.mxu3 %v199_v49  ;;  %v101_v54 = vld [vmem:[#allocation3 + $0x20] sm:$0xff]  ;;  %v212_v25 = vld [vmem:[#allocation3 + $0x398] sm:$0xff] }
  0x2e   :  { %v135_v51 = vld [vmem:[#allocation3 + $0x130] sm:$0xff]  ;;  %v133_v55 = vld [vmem:[#allocation3 + $0x120] sm:$0xff]  ;;  %247 = vmatpush.msra.mxu0 %v103_v50  ;;  %288 = vmatpush.msra.mxu2 %v165_v52  ;;  %v178_v26 = vld [vmem:[#allocation3 + $0x288] sm:$0xff] }
  0x2f   :  { %267 = vmatpush.msra.mxu1 %v135_v51  ;;  %v163_v56 = vld [vmem:[#allocation3 + $0x210] sm:$0xff]  ;;  %308 = vmatpush.msra.mxu3 %v197_v53  ;;  %v161_v60 = vld [vmem:[#allocation3 + $0x200] sm:$0xff]  ;;  %v116_v27 = vld [vmem:[#allocation3 + $0x98] sm:$0xff] }
  0x30   :  { %v195_v57 = vld [vmem:[#allocation3 + $0x310] sm:$0xff]  ;;  %248 = vmatpush.msra.mxu0 %v101_v54  ;;  %v193_v61 = vld [vmem:[#allocation3 + $0x300] sm:$0xff]  ;;  %289 = vmatpush.msra.mxu2 %v163_v56  ;;  %v148_v28 = vld [vmem:[#allocation3 + $0x198] sm:$0xff] }
  0x31   :  { %v99_v58 = vld [vmem:[#allocation3 + $0x10] sm:$0xff]  ;;  %268 = vmatpush.msra.mxu1 %v133_v55  ;;  %309 = vmatpush.msra.mxu3 %v195_v57  ;;  %v97_v0 = vld [vmem:[#allocation3] sm:$0xff]  ;;  %v210_v29 = vld [vmem:[#allocation3 + $0x388] sm:$0xff] }
  0x32   :  { %v131_v59 = vld [vmem:[#allocation3 + $0x110] sm:$0xff]  ;;  %249 = vmatpush.msra.mxu0 %v99_v58  ;;  %v129_v1 = vld [vmem:[#allocation3 + $0x100] sm:$0xff]  ;;  %290 = vmatpush.msra.mxu2 %v161_v60  ;;  %v176_v30 = vld [vmem:[#allocation3 + $0x278] sm:$0xff] }
  0x33   :  { %269 = vmatpush.msra.mxu1 %v131_v59  ;;  %310 = vmatpush.msra.mxu3 %v193_v61  ;;  %v114_v31 = vld [vmem:[#allocation3 + $0x88] sm:$0xff]  ;;  %v208_v33 = vld [vmem:[#allocation3 + $0x378] sm:$0xff] }
  0x34   :  { %355 = vmatpush.msrb.mxu2 %v192_v62  ;;  %250 = vmatpush.msra.mxu0 %v97_v0  ;;  %v146_v32 = vld [vmem:[#allocation3 + $0x188] sm:$0xff]  ;;  %v112_v35 = vld [vmem:[#allocation3 + $0x78] sm:$0xff] }
  0x35   :  { %375 = vmatpush.msrb.mxu3 %v224_v63  ;;  %270 = vmatpush.msra.mxu1 %v129_v1  ;;  %v174_v34 = vld [vmem:[#allocation3 + $0x268] sm:$0xff]  ;;  %v144_v36 = vld [vmem:[#allocation3 + $0x178] sm:$0xff] }
  0x36   :  { %356 = vmatpush.msrb.mxu2 %v190_v2  ;;  %315 = vmatpush.msrb.mxu0 %v128_v3  ;;  %v206_v37 = vld [vmem:[#allocation3 + $0x368] sm:$0xff]  ;;  %v1319_v38 = vld [vmem:[%s1404_s0] sm:$0xf] }
  0x37   :  { %335 = vmatpush.msrb.mxu1 %v160_v4  ;;  %376 = vmatpush.msrb.mxu3 %v222_v5  ;;  %v172_v39 = vld [vmem:[#allocation3 + $0x258] sm:$0xff]  ;;  %v110_v40 = vld [vmem:[#allocation3 + $0x68] sm:$0xff]  ;;  %v229_v44 = vperm.slane %v1319_v38, 2  ;;  %v230_v49 = vperm.slane %v1319_v38, 3  ;;  %v227_v53 = vperm.slane %v1319_v38, 0  ;;  %v228_v55 = vperm.slane %v1319_v38, 1 }
  0x38   :  { %357 = vmatpush.msrb.mxu2 %v188_v6  ;;  %316 = vmatpush.msrb.mxu0 %v126_v7  ;;  %v142_v41 = vld [vmem:[#allocation3 + $0x168] sm:$0xff]  ;;  %v204_v42 = vld [vmem:[#allocation3 + $0x358] sm:$0xff]  ;;  %v452_v7 = vld [vmem:[#allocation5 + $0xf0] sm:$0xff] }
  0x39   :  { %336 = vmatpush.msrb.mxu1 %v158_v8  ;;  %377 = vmatpush.msrb.mxu3 %v220_v9  ;;  %v170_v43 = vld [vmem:[#allocation3 + $0x248] sm:$0xff]  ;;  %v108_v45 = vld [vmem:[#allocation3 + $0x58] sm:$0xff] }
  0x3a   :  { %358 = vmatpush.msrb.mxu2 %v186_v10  ;;  %317 = vmatpush.msrb.mxu0 %v124_v11  ;;  %v140_v46 = vld [vmem:[#allocation3 + $0x158] sm:$0xff]  ;;  %v202_v48 = vld [vmem:[#allocation3 + $0x348] sm:$0xff]  ;;  %v450_v11 = vld [vmem:[#allocation5 + $0xe0] sm:$0xff] }
  0x3b   :  { %337 = vmatpush.msrb.mxu1 %v156_v12  ;;  %378 = vmatpush.msrb.mxu3 %v218_v13  ;;  %v168_v47 = vld [vmem:[#allocation3 + $0x238] sm:$0xff]  ;;  %v106_v50 = vld [vmem:[#allocation3 + $0x48] sm:$0xff] }
  0x3c   :  { %359 = vmatpush.msrb.mxu2 %v184_v14  ;;  %318 = vmatpush.msrb.mxu0 %v122_v15  ;;  %v138_v51 = vld [vmem:[#allocation3 + $0x148] sm:$0xff]  ;;  %v200_v54 = vld [vmem:[#allocation3 + $0x338] sm:$0xff]  ;;  %v448_v14 = vld [vmem:[#allocation5 + $0xd0] sm:$0xff] }
  0x3d   :  { %338 = vmatpush.msrb.mxu1 %v154_v16  ;;  %379 = vmatpush.msrb.mxu3 %v216_v17  ;;  %v166_v52 = vld [vmem:[#allocation3 + $0x228] sm:$0xff]  ;;  %v104_v56 = vld [vmem:[#allocation3 + $0x38] sm:$0xff]  ;;  %v446_v17 = vld [vmem:[#allocation5 + $0xc0] sm:$0xff] }
  0x3e   :  { %360 = vmatpush.msrb.mxu2 %v182_v18  ;;  %319 = vmatpush.msrb.mxu0 %v120_v19  ;;  %v136_v57 = vld [vmem:[#allocation3 + $0x138] sm:$0xff]  ;;  %v198_v59 = vld [vmem:[#allocation3 + $0x328] sm:$0xff] }
  0x3f   :  { %339 = vmatpush.msrb.mxu1 %v152_v20  ;;  %380 = vmatpush.msrb.mxu3 %v214_v21  ;;  %v164_v58 = vld [vmem:[#allocation3 + $0x218] sm:$0xff]  ;;  %v102_v60 = vld [vmem:[#allocation3 + $0x28] sm:$0xff]  ;;  %v444_v20 = vld [vmem:[#allocation5 + $0xb0] sm:$0xff] }
  0x40   :  { %361 = vmatpush.msrb.mxu2 %v180_v22  ;;  %320 = vmatpush.msrb.mxu0 %v118_v23  ;;  %v134_v61 = vld [vmem:[#allocation3 + $0x128] sm:$0xff]  ;;  %v196_v63 = vld [vmem:[#allocation3 + $0x318] sm:$0xff] }
  0x41   :  { %340 = vmatpush.msrb.mxu1 %v150_v24  ;;  %381 = vmatpush.msrb.mxu3 %v212_v25  ;;  %v162_v62 = vld [vmem:[#allocation3 + $0x208] sm:$0xff]  ;;  %v100_v0 = vld [vmem:[#allocation3 + $0x18] sm:$0xff] }
  0x42   :  { %362 = vmatpush.msrb.mxu2 %v178_v26  ;;  %321 = vmatpush.msrb.mxu0 %v116_v27  ;;  %v132_v1 = vld [vmem:[#allocation3 + $0x118] sm:$0xff]  ;;  %v194_v2 = vld [vmem:[#allocation3 + $0x308] sm:$0xff]  ;;  %v442_v26 = vld [vmem:[#allocation5 + $0xa0] sm:$0xff] }
  0x43   :  { %341 = vmatpush.msrb.mxu1 %v148_v28  ;;  %382 = vmatpush.msrb.mxu3 %v210_v29  ;;  %v98_v3 = vld [vmem:[#allocation3 + $0x8] sm:$0xff]  ;;  %v453_v8 = vld [vmem:[#allocation5 + $0xf8] sm:$0xff] }
  0x44   :  { %363 = vmatpush.msrb.mxu2 %v176_v30  ;;  %322 = vmatpush.msrb.mxu0 %v114_v31  ;;  %v130_v4 = vld [vmem:[#allocation3 + $0x108] sm:$0xff]  ;;  %v449_v15 = vld [vmem:[#allocation5 + $0xd8] sm:$0xff]  ;;  %v440_v31 = vld [vmem:[#allocation5 + $0x90] sm:$0xff] }
  0x45   :  { %342 = vmatpush.msrb.mxu1 %v146_v32  ;;  %383 = vmatpush.msrb.mxu3 %v208_v33  ;;  %v451_v12 = vld [vmem:[#allocation5 + $0xe8] sm:$0xff]  ;;  %v445_v21 = vld [vmem:[#allocation5 + $0xb8] sm:$0xff] }
  0x46   :  { %364 = vmatpush.msrb.mxu2 %v174_v34  ;;  %323 = vmatpush.msrb.mxu0 %v112_v35  ;;  %v447_v18 = vld [vmem:[#allocation5 + $0xc8] sm:$0xff]  ;;  %v395_v28 = vld [vmem:[%s1406_s2] sm:$0x3] }
  0x47   :  { %343 = vmatpush.msrb.mxu1 %v144_v36  ;;  %384 = vmatpush.msrb.mxu3 %v206_v37  ;;  %v443_v27 = vld [vmem:[#allocation5 + $0xa8] sm:$0xff]  ;;  %v398_v30 = vperm.slane %v395_v28, 1  ;;  %v441_v32 = vld [vmem:[#allocation5 + $0x98] sm:$0xff]  ;;  %v438_v36 = vld [vmem:[#allocation5 + $0x80] sm:$0xff] }
  0x48   :  { %365 = vmatpush.msrb.mxu2 %v172_v39  ;;  %324 = vmatpush.msrb.mxu0 %v110_v40  ;;  %v439_v37 = vld [vmem:[#allocation5 + $0x88] sm:$0xff]  ;;  %v436_v39 = vld [vmem:[#allocation5 + $0x70] sm:$0xff]  ;;  %v437_v40 = vld [vmem:[#allocation5 + $0x78] sm:$0xff] }
  0x49   :  { %344 = vmatpush.msrb.mxu1 %v142_v41  ;;  %385 = vmatpush.msrb.mxu3 %v204_v42 }
  0x4a   :  { %366 = vmatpush.msrb.mxu2 %v170_v43  ;;  %325 = vmatpush.msrb.mxu0 %v108_v45  ;;  %v434_v43 = vld [vmem:[#allocation5 + $0x60] sm:$0xff] }
  0x4b   :  { %291 = vmatmul.f32.vlgmr.msra.gmra.mxu2 %v229_v44  ;;  %345 = vmatpush.msrb.mxu1 %v140_v46  ;;  %v432_v46 = vld [vmem:[#allocation5 + $0x50] sm:$0xff] }
  0x4c   :  { %367 = vmatpush.msrb.mxu2 %v168_v47  ;;  %386 = vmatpush.msrb.mxu3 %v202_v48  ;;  %v433_v47 = vld [vmem:[#allocation5 + $0x58] sm:$0xff] }
  0x4d   :  { %311 = vmatmul.f32.vlgmr.msra.gmra.mxu3 %v230_v49  ;;  %326 = vmatpush.msrb.mxu0 %v106_v50  ;;  %v431_v50 = vld [vmem:[#allocation5 + $0x48] sm:$0xff] }
  0x4e   :  { %346 = vmatpush.msrb.mxu1 %v138_v51  ;;  %368 = vmatpush.msrb.mxu2 %v166_v52  ;;  %v428_v51 = vld [vmem:[#allocation5 + $0x30] sm:$0xff]  ;;  %v429_v52 = vld [vmem:[#allocation5 + $0x38] sm:$0xff] }
  0x4f   :  { %387 = vmatpush.msrb.mxu3 %v200_v54  ;;  %251 = vmatmul.f32.vlgmr.msra.gmra.mxu0 %v227_v53  ;;  %v427_v54 = vld [vmem:[#allocation5 + $0x28] sm:$0xff] }
  0x50   :  { %271 = vmatmul.f32.vlgmr.msra.gmra.mxu1 %v228_v55  ;;  %327 = vmatpush.msrb.mxu0 %v104_v56  ;;  %v425_v56 = vld [vmem:[#allocation5 + $0x18] sm:$0xff] }
  0x51   :  { %347 = vmatpush.msrb.mxu1 %v136_v57  ;;  %369 = vmatpush.msrb.mxu2 %v164_v58  ;;  %v422_v57 = vld [vmem:[#allocation5] sm:$0xff]  ;;  %v423_v58 = vld [vmem:[#allocation5 + $0x8] sm:$0xff] }
  0x52   :  { %388 = vmatpush.msrb.mxu3 %v198_v59  ;;  %328 = vmatpush.msrb.mxu0 %v102_v60 }
  0x53   :  { %348 = vmatpush.msrb.mxu1 %v134_v61  ;;  %370 = vmatpush.msrb.mxu2 %v162_v62 }
  0x54   :  { %389 = vmatpush.msrb.mxu3 %v196_v63  ;;  %371 = vmatmul.f32.vlgmr.msrb.gmra.mxu2 %v229_v44  ;;  %v435_v44 = vld [vmem:[#allocation5 + $0x68] sm:$0xff] }
  0x55   :  { %329 = vmatpush.msrb.mxu0 %v100_v0  ;;  %349 = vmatpush.msrb.mxu1 %v132_v1 }
  0x56   :  { %390 = vmatpush.msrb.mxu3 %v194_v2 }
  0x57   :  { %391 = vmatmul.f32.vlgmr.msrb.gmra.mxu3 %v230_v49  ;;  %330 = vmatpush.msrb.mxu0 %v98_v3  ;;  %v430_v49 = vld [vmem:[#allocation5 + $0x40] sm:$0xff] }
  0x58   :  { %350 = vmatpush.msrb.mxu1 %v130_v4  ;;  %331 = vmatmul.f32.vlgmr.msrb.gmra.mxu0 %v227_v53  ;;  %v426_v53 = vld [vmem:[#allocation5 + $0x20] sm:$0xff] }
  0x59   :  { %351 = vmatmul.f32.vlgmr.msrb.gmra.mxu1 %v228_v55  ;;  %455 = vmatpush.msra.mxu0 %v452_v7  ;;  %v424_v55 = vld [vmem:[#allocation5 + $0x10] sm:$0xff] }
  0x5a   :  { %475 = vmatpush.msra.mxu1 %v453_v8  ;;  %v560_v8 = vld [vmem:[#allocation7 + $0xf0] sm:$0xff] }
  0x5b   :  { %456 = vmatpush.msra.mxu0 %v450_v11  ;;  %563 = vmatpush.msra.mxu2 %v560_v8  ;;  %v559_v11 = vld [vmem:[#allocation7 + $0xe8] sm:$0xff] }
  0x5c   :  { %476 = vmatpush.msra.mxu1 %v451_v12  ;;  %v556_v12 = vld [vmem:[#allocation7 + $0xd0] sm:$0xff]  ;;  %v751_v8 = vld [vmem:[#allocation8 + $0x388] sm:$0xff] }
  0x5d   :  { %457 = vmatpush.msra.mxu0 %v448_v14  ;;  %v554_v14 = vld [vmem:[#allocation7 + $0xc0] sm:$0xff] }
  0x5e   :  { %477 = vmatpush.msra.mxu1 %v449_v15  ;;  %v555_v15 = vld [vmem:[#allocation7 + $0xc8] sm:$0xff] }
  0x5f   :  { %458 = vmatpush.msra.mxu0 %v446_v17  ;;  %v553_v17 = vld [vmem:[#allocation7 + $0xb8] sm:$0xff] }
  0x60   :  { %478 = vmatpush.msra.mxu1 %v447_v18  ;;  %v495_v18 = vld [vmem:[%s1408_s4] sm:$0x3] }
  0x61   :  { %459 = vmatpush.msra.mxu0 %v444_v20  ;;  %v551_v20 = vld [vmem:[#allocation7 + $0xa8] sm:$0xff] }
  0x62   :  { %479 = vmatpush.msra.mxu1 %v445_v21 }
  0x63   :  { %460 = vmatpush.msra.mxu0 %v442_v26  ;;  %v548_v26 = vld [vmem:[#allocation7 + $0x90] sm:$0xff] }
  0x64   :  { %480 = vmatpush.msra.mxu1 %v443_v27  ;;  %v549_v27 = vld [vmem:[#allocation7 + $0x98] sm:$0xff] }
  0x65   :  { %461 = vmatpush.msra.mxu0 %v440_v31  ;;  %v547_v31 = vld [vmem:[#allocation7 + $0x88] sm:$0xff] }
  0x66   :  { %481 = vmatpush.msra.mxu1 %v441_v32 }
  0x67   :  { %462 = vmatpush.msra.mxu0 %v438_v36 }
  0x68   :  { %482 = vmatpush.msra.mxu1 %v439_v37 }
  0x69   :  { %463 = vmatpush.msra.mxu0 %v436_v39  ;;  %v543_v39 = vld [vmem:[#allocation7 + $0x68] sm:$0xff] }
  0x6a   :  { %483 = vmatpush.msra.mxu1 %v437_v40 }
  0x6b   :  { %464 = vmatpush.msra.mxu0 %v434_v43 }
  0x6c   :  { %484 = vmatpush.msra.mxu1 %v435_v44  ;;  %v538_v44 = vld [vmem:[#allocation7 + $0x40] sm:$0xff] }
  0x6d   :  { %465 = vmatpush.msra.mxu0 %v432_v46  ;;  %v536_v46 = vld [vmem:[#allocation7 + $0x30] sm:$0xff] }
  0x6e   :  { %485 = vmatpush.msra.mxu1 %v433_v47  ;;  %v537_v47 = vld [vmem:[#allocation7 + $0x38] sm:$0xff] }
  0x6f   :  { %466 = vmatpush.msra.mxu0 %v430_v49  ;;  %v535_v49 = vld [vmem:[#allocation7 + $0x28] sm:$0xff] }
  0x70   :  { %486 = vmatpush.msra.mxu1 %v431_v50  ;;  %v532_v50 = vld [vmem:[#allocation7 + $0x10] sm:$0xff] }
  0x71   :  { %467 = vmatpush.msra.mxu0 %v428_v51  ;;  %v533_v51 = vld [vmem:[#allocation7 + $0x18] sm:$0xff] }
  0x72   :  { %487 = vmatpush.msra.mxu1 %v429_v52  ;;  %v530_v52 = vld [vmem:[#allocation7] sm:$0xff] }
  0x73   :  { %468 = vmatpush.msra.mxu0 %v426_v53  ;;  %v531_v53 = vld [vmem:[#allocation7 + $0x8] sm:$0xff] }
  0x74   :  { %488 = vmatpush.msra.mxu1 %v427_v54 }
  0x75   :  { %469 = vmatpush.msra.mxu0 %v424_v55 }
  0x76   :  { %489 = vmatpush.msra.mxu1 %v425_v56  ;;  %v758_v56 = vld [vmem:[#allocation8 + $0x3c0] sm:$0xff] }
  0x77   :  { %470 = vmatpush.msra.mxu0 %v422_v57  ;;  %v759_v57 = vld [vmem:[#allocation8 + $0x3c8] sm:$0xff] }
  0x78   :  { %490 = vmatpush.msra.mxu1 %v423_v58 }
  0x79   :  { %767 = vmatpush.msrb.mxu0 %v758_v56  ;;  %v655_v56 = vld [vmem:[#allocation8 + $0x88] sm:$0xff] }
  0x7a   :  { %787 = vmatpush.msrb.mxu1 %v759_v57  ;;  %v656_v57 = vld [vmem:[#allocation8 + $0x90] sm:$0xff] }
  0x7c   :  { %788 = vmatpush.msrb.mxu1 %v751_v8  ;;  %v754_v8 = vld [vmem:[#allocation8 + $0x3a0] sm:$0xff] }
  0xcc   :  { %v252_v5 = vpop.f32.mrf.mxu0 }
  0xcd   :  { %v272_v6 = vpop.f32.mrf.mxu1 }
  0xce   :  { %v292_v9 = vpop.f32.mrf.mxu2  ;;  %v273_v10 = vadd.f32 %v272_v6, %v252_v5 }
  0xd0   :  { %v312_v13 = vpop.f32.mrf.mxu3  ;;  %v293_v16 = vadd.f32 %v292_v9, %v273_v10  ;;  %v561_v9 = vld [vmem:[#allocation7 + $0xf8] sm:$0xff]  ;;  %v558_v10 = vld [vmem:[#allocation7 + $0xe0] sm:$0xff] }
  0xd1   :  { %583 = vmatpush.msra.mxu3 %v561_v9  ;;  %564 = vmatpush.msra.mxu2 %v558_v10  ;;  %v752_v9 = vld [vmem:[#allocation8 + $0x390] sm:$0xff]  ;;  %v753_v10 = vld [vmem:[#allocation8 + $0x398] sm:$0xff] }
  0xd2   :  { %v313_v23 = vadd.f32 %v312_v13, %v293_v16  ;;  %v557_v13 = vld [vmem:[#allocation7 + $0xd8] sm:$0xff]  ;;  %v552_v16 = vld [vmem:[#allocation7 + $0xb0] sm:$0xff] }
  0xd3   :  { %584 = vmatpush.msra.mxu3 %v559_v11  ;;  %565 = vmatpush.msra.mxu2 %v556_v12  ;;  %v742_v11 = vld [vmem:[#allocation8 + $0x340] sm:$0xff]  ;;  %v743_v12 = vld [vmem:[#allocation8 + $0x348] sm:$0xff] }
  0xd4   :  { %v396_v34 = vadd.f32 %v395_v28, %v313_v23  ;;  %789 = vmatpush.msrb.mxu1 %v743_v12 }
  0xd5   :  { %v332_v19 = vpop.f32.mrf.mxu0  ;;  %585 = vmatpush.msra.mxu3 %v557_v13  ;;  %566 = vmatpush.msra.mxu2 %v554_v14  ;;  %v744_v13 = vld [vmem:[#allocation8 + $0x350] sm:$0xff]  ;;  %v745_v14 = vld [vmem:[#allocation8 + $0x358] sm:$0xff] }
  0xd6   :  { %v352_v22 = vpop.f32.mrf.mxu1  ;;  %v401_v41 = vmul.f32 %v396_v34, %v396_v34 }
  0xd7   :  { %v353_v24 = vadd.f32 %v352_v22, %v332_v19  ;;  %v372_v25 = vpop.f32.mrf.mxu2  ;;  %586 = vmatpush.msra.mxu3 %v555_v15  ;;  %567 = vmatpush.msra.mxu2 %v552_v16  ;;  %v550_v19 = vld [vmem:[#allocation7 + $0xa0] sm:$0xff]  ;;  %v735_v16 = vld [vmem:[#allocation8 + $0x308] sm:$0xff] }
  0xd8   :  { %v734_v15 = vld [vmem:[#allocation8 + $0x300] sm:$0xff]  ;;  %790 = vmatpush.msrb.mxu1 %v735_v16 }
  0xd9   :  { %v373_v29 = vadd.f32 %v372_v25, %v353_v24  ;;  %587 = vmatpush.msra.mxu3 %v553_v17  ;;  %568 = vmatpush.msra.mxu2 %v550_v19  ;;  %v506_v25 = vperm.slane %v495_v18, 1  ;;  %v736_v17 = vld [vmem:[#allocation8 + $0x310] sm:$0xff]  ;;  %v726_v19 = vld [vmem:[#allocation8 + $0x2c0] sm:$0xff] }
  0xda   :  { %v392_v33 = vpop.f32.mrf.mxu3 }
  0xdb   :  { %v393_v35 = vadd.f32 %v392_v33, %v373_v29  ;;  %588 = vmatpush.msra.mxu3 %v551_v20  ;;  %569 = vmatpush.msra.mxu2 %v548_v26  ;;  %v727_v20 = vld [vmem:[#allocation8 + $0x2c8] sm:$0xff]  ;;  %v721_v26 = vld [vmem:[#allocation8 + $0x298] sm:$0xff] }
  0xdc   :  { %791 = vmatpush.msrb.mxu1 %v727_v20  ;;  %v749_v20 = vld [vmem:[#allocation8 + $0x378] sm:$0xff] }
  0xdd   :  { %v400_v38 = vadd.f32 %v398_v30, %v393_v35  ;;  %589 = vmatpush.msra.mxu3 %v549_v27  ;;  %v546_v30 = vld [vmem:[#allocation7 + $0x80] sm:$0xff]  ;;  %v545_v35 = vld [vmem:[#allocation7 + $0x78] sm:$0xff] }
  0xde   :  { %570 = vmatpush.msra.mxu2 %v546_v30  ;;  %v710_v27 = vld [vmem:[#allocation8 + $0x240] sm:$0xff]  ;;  %v713_v30 = vld [vmem:[#allocation8 + $0x258] sm:$0xff] }
  0xdf   :  { %v402_v42 = vmul.f32 %v400_v38, %v400_v38  ;;  %590 = vmatpush.msra.mxu3 %v547_v31  ;;  %v702_v31 = vld [vmem:[#allocation8 + $0x200] sm:$0xff] }
  0xe1   :  { %v403_v45 = vadd.f32 %v402_v42, %v401_v41  ;;  %591 = vmatpush.msra.mxu3 %v545_v35  ;;  %v540_v41 = vld [vmem:[#allocation7 + $0x50] sm:$0xff]  ;;  %v541_v42 = vld [vmem:[#allocation7 + $0x58] sm:$0xff]  ;;  %v694_v35 = vld [vmem:[#allocation8 + $0x1c0] sm:$0xff] }
  0xe3   :  { %v404_v48 = vmax.f32 %v403_v45, 1e-30  ;;  %592 = vmatpush.msra.mxu3 %v543_v39  ;;  %v686_v39 = vld [vmem:[#allocation8 + $0x180] sm:$0xff] }
  0xe5   :  { %1111 = vrsqrt.f32 %v404_v48  ;;  %vm411_vm1 = vweird.f32 %v404_v48  ;;  %593 = vmatpush.msra.mxu3 %v541_v42  ;;  %v689_v42 = vld [vmem:[#allocation8 + $0x198] sm:$0xff] }
  0xeb   :  { %v1112_v59 = vpop.eup %1111 }
  0xec   :  { %v406_v60 = vmul.f32 %v1112_v59, %v404_v48  ;;  %vm412_vm0 = vweird.f32 %v1112_v59  ;;  %v534_v48 = vld [vmem:[#allocation7 + $0x20] sm:$0xff] }
  0xed   :  { %vm413_vm2 = vmor %vm411_vm1, %vm412_vm0 }
  0xee   :  { %v407_v61 = vmul.f32 %v1112_v59, %v406_v60  ;;  %v761_v60 = vld [vmem:[#allocation8 + $0x3d8] sm:$0xff] }
  0xf0   :  { %v408_v62 = vmul.f32 0.5, %v407_v61 }
  0xf2   :  { %v409_v63 = vsub.f32 1.5, %v408_v62 }
  0xf4   :  { %v410_v0 = vmul.f32 %v1112_v59, %v409_v63 }
  0xf6   :  { %v414_v1 = vsel %vm413_vm2, %v1112_v59, %v410_v0  ;;  %v760_v59 = vld [vmem:[#allocation8 + $0x3d0] sm:$0xff] }
  0xf7   :  { %v415_v2 = vmul.f32 %v414_v1, %v403_v45  ;;  %v539_v45 = vld [vmem:[#allocation7 + $0x48] sm:$0xff] }
  0xf8   :  { %594 = vmatpush.msra.mxu3 %v539_v45  ;;  %v680_v45 = vld [vmem:[#allocation8 + $0x150] sm:$0xff] }
  0xf9   :  { %1113 = vtanh.f32 %v415_v2 }
  0xfa   :  { %595 = vmatpush.msra.mxu3 %v537_v47  ;;  %v670_v47 = vld [vmem:[#allocation8 + $0x100] sm:$0xff] }
  0xfc   :  { %596 = vmatpush.msra.mxu3 %v535_v49  ;;  %v672_v49 = vld [vmem:[#allocation8 + $0x110] sm:$0xff] }
  0xfe   :  { %597 = vmatpush.msra.mxu3 %v533_v51  ;;  %v662_v51 = vld [vmem:[#allocation8 + $0xc0] sm:$0xff] }
  0xff   :  { %v1114_v3 = vpop.eup %1113 }
 0x100   :  { %v417_v4 = vmul.f32 %v1114_v3, %v414_v1  ;;  %598 = vmatpush.msra.mxu3 %v531_v53  ;;  %v664_v53 = vld [vmem:[#allocation8 + $0xd0] sm:$0xff] }
 0x102   :  { %v418_v5 = vmul.f32 %v417_v4, %v396_v34  ;;  %v419_v6 = vmul.f32 %v417_v4, %v400_v38  ;;  %v544_v34 = vld [vmem:[#allocation7 + $0x70] sm:$0xff]  ;;  %v542_v38 = vld [vmem:[#allocation7 + $0x60] sm:$0xff]  ;;  %827 = vmatpush.msrb.mxu3 %v761_v60  ;;  %v647_v60 = vld [vmem:[#allocation8 + $0x48] sm:$0xff] }
 0x103   :  { %571 = vmatpush.msra.mxu2 %v544_v34  ;;  %v705_v34 = vld [vmem:[#allocation8 + $0x218] sm:$0xff] }
 0x104   :  { %420 = vst [vmem:[#allocation2] sm:$0x1] %v418_v5  ;;  %828 = vmatpush.msrb.mxu3 %v753_v10  ;;  %v756_v10 = vld [vmem:[#allocation8 + $0x3b0] sm:$0xff] }
 0x105   :  { %421 = vst [vmem:[#allocation2 + $0x1] sm:$0x1] %v419_v6  ;;  %572 = vmatpush.msra.mxu2 %v542_v38  ;;  %v697_v38 = vld [vmem:[#allocation8 + $0x1d8] sm:$0xff] }
 0x106   :  { %829 = vmatpush.msrb.mxu3 %v745_v14 }
 0x107   :  { %573 = vmatpush.msra.mxu2 %v540_v41  ;;  %v688_v41 = vld [vmem:[#allocation8 + $0x190] sm:$0xff] }
 0x109   :  { %574 = vmatpush.msra.mxu2 %v538_v44  ;;  %v679_v44 = vld [vmem:[#allocation8 + $0x148] sm:$0xff] }
 0x10b   :  { %575 = vmatpush.msra.mxu2 %v536_v46  ;;  %v681_v46 = vld [vmem:[#allocation8 + $0x158] sm:$0xff] }
 0x10c   :  { %v454_v7 = vld [vmem:[#allocation2] sm:$0x3] }
 0x10d   :  { %471 = vmatmul.f32.vlgmr.msra.gmra.mxu0 %v454_v7  ;;  %491 = vmatmul.f32.vlgmr.msra.gmra.mxu1 %v454_v7  ;;  %v750_v7 = vld [vmem:[#allocation8 + $0x380] sm:$0xff] }
 0x10e   :  { %576 = vmatpush.msra.mxu2 %v534_v48  ;;  %768 = vmatpush.msrb.mxu0 %v750_v7  ;;  %v671_v48 = vld [vmem:[#allocation8 + $0x108] sm:$0xff]  ;;  %v765_v7 = vld [vmem:[#allocation8 + $0x3f8] sm:$0xff] }
 0x110   :  { %577 = vmatpush.msra.mxu2 %v532_v50  ;;  %769 = vmatpush.msrb.mxu0 %v742_v11  ;;  %v673_v50 = vld [vmem:[#allocation8 + $0x118] sm:$0xff] }
 0x112   :  { %578 = vmatpush.msra.mxu2 %v530_v52  ;;  %770 = vmatpush.msrb.mxu0 %v734_v15  ;;  %v663_v52 = vld [vmem:[#allocation8 + $0xc8] sm:$0xff] }
 0x114   :  { %807 = vmatpush.msrb.mxu2 %v760_v59  ;;  %771 = vmatpush.msrb.mxu0 %v726_v19  ;;  %v646_v59 = vld [vmem:[#allocation8 + $0x40] sm:$0xff]  ;;  %v748_v19 = vld [vmem:[#allocation8 + $0x370] sm:$0xff] }
 0x116   :  { %808 = vmatpush.msrb.mxu2 %v752_v9  ;;  %v755_v9 = vld [vmem:[#allocation8 + $0x3a8] sm:$0xff] }
 0x118   :  { %809 = vmatpush.msrb.mxu2 %v744_v13  ;;  %v757_v13 = vld [vmem:[#allocation8 + $0x3b8] sm:$0xff] }
 0x11a   :  { %810 = vmatpush.msrb.mxu2 %v736_v17  ;;  %v746_v17 = vld [vmem:[#allocation8 + $0x360] sm:$0xff] }
 0x18a   :  { %v472_v21 = vpop.f32.mrf.mxu0  ;;  %v492_v22 = vpop.f32.mrf.mxu1 }
 0x18b   :  { %v502_v23 = vrot.slane %v472_v21, 1  ;;  %v497_v24 = vrot.slane %v492_v22, 1 }
 0x18d   :  { %v499_v28 = vsub.f32 %v472_v21, %v497_v24  ;;  %v504_v29 = vadd.f32 %v502_v23, %v492_v22  ;;  %v728_v21 = vld [vmem:[#allocation8 + $0x2d0] sm:$0xff]  ;;  %v729_v22 = vld [vmem:[#allocation8 + $0x2d8] sm:$0xff]  ;;  %v718_v23 = vld [vmem:[#allocation8 + $0x280] sm:$0xff] }
 0x18e   :  { %811 = vmatpush.msrb.mxu2 %v728_v21  ;;  %v719_v24 = vld [vmem:[#allocation8 + $0x288] sm:$0xff]  ;;  %772 = vmatpush.msrb.mxu0 %v718_v23  ;;  %v738_v23 = vld [vmem:[#allocation8 + $0x320] sm:$0xff] }
 0x18f   :  { %v500_v32 = vadd.f32 %v499_v28, %v495_v18  ;;  %v508_v33 = vadd.f32 %v506_v25, %v504_v29  ;;  %v737_v18 = vld [vmem:[#allocation8 + $0x318] sm:$0xff]  ;;  %v720_v25 = vld [vmem:[#allocation8 + $0x290] sm:$0xff]  ;;  %792 = vmatpush.msrb.mxu1 %v719_v24  ;;  %v711_v28 = vld [vmem:[#allocation8 + $0x248] sm:$0xff] }
 0x190   :  { %830 = vmatpush.msrb.mxu3 %v737_v18  ;;  %812 = vmatpush.msrb.mxu2 %v720_v25  ;;  %v712_v29 = vld [vmem:[#allocation8 + $0x250] sm:$0xff]  ;;  %v747_v18 = vld [vmem:[#allocation8 + $0x368] sm:$0xff] }
 0x191   :  { %v509_v36 = vmul.f32 %v500_v32, %v500_v32  ;;  %v510_v37 = vmul.f32 %v508_v33, %v508_v33  ;;  %773 = vmatpush.msrb.mxu0 %v710_v27  ;;  %793 = vmatpush.msrb.mxu1 %v711_v28  ;;  %v739_v24 = vld [vmem:[#allocation8 + $0x328] sm:$0xff]  ;;  %v740_v25 = vld [vmem:[#allocation8 + $0x330] sm:$0xff] }
 0x192   :  { %831 = vmatpush.msrb.mxu3 %v729_v22  ;;  %813 = vmatpush.msrb.mxu2 %v712_v29  ;;  %v730_v29 = vld [vmem:[#allocation8 + $0x2e0] sm:$0xff] }
 0x193   :  { %v511_v40 = vadd.f32 %v510_v37, %v509_v36  ;;  %774 = vmatpush.msrb.mxu0 %v702_v31  ;;  %v695_v36 = vld [vmem:[#allocation8 + $0x1c8] sm:$0xff]  ;;  %v696_v37 = vld [vmem:[#allocation8 + $0x1d0] sm:$0xff] }
 0x194   :  { %832 = vmatpush.msrb.mxu3 %v721_v26  ;;  %v741_v26 = vld [vmem:[#allocation8 + $0x338] sm:$0xff]  ;;  %v732_v31 = vld [vmem:[#allocation8 + $0x2f0] sm:$0xff] }
 0x195   :  { %v512_v43 = vmax.f32 %v511_v40, 1e-30  ;;  %775 = vmatpush.msrb.mxu0 %v694_v35  ;;  %v722_v35 = vld [vmem:[#allocation8 + $0x2a0] sm:$0xff] }
 0x196   :  { %833 = vmatpush.msrb.mxu3 %v713_v30  ;;  %v731_v30 = vld [vmem:[#allocation8 + $0x2e8] sm:$0xff] }
 0x197   :  { %1115 = vrsqrt.f32 %v512_v43  ;;  %vm519_vm4 = vweird.f32 %v512_v43  ;;  %776 = vmatpush.msrb.mxu0 %v686_v39 }
 0x198   :  { %834 = vmatpush.msrb.mxu3 %v705_v34 }
 0x19a   :  { %835 = vmatpush.msrb.mxu3 %v697_v38  ;;  %v725_v38 = vld [vmem:[#allocation8 + $0x2b8] sm:$0xff] }
 0x19c   :  { %836 = vmatpush.msrb.mxu3 %v689_v42  ;;  %v716_v42 = vld [vmem:[#allocation8 + $0x270] sm:$0xff] }
 0x19d   :  { %v1116_v54 = vpop.eup %1115 }
 0x19e   :  { %v514_v55 = vmul.f32 %v1116_v54, %v512_v43  ;;  %vm520_vm3 = vweird.f32 %v1116_v54  ;;  %v678_v43 = vld [vmem:[#allocation8 + $0x140] sm:$0xff]  ;;  %837 = vmatpush.msrb.mxu3 %v681_v46  ;;  %v707_v46 = vld [vmem:[#allocation8 + $0x228] sm:$0xff] }
 0x19f   :  { %vm521_vm5 = vmor %vm519_vm4, %vm520_vm3  ;;  %777 = vmatpush.msrb.mxu0 %v678_v43  ;;  %v717_v43 = vld [vmem:[#allocation8 + $0x278] sm:$0xff] }
 0x1a0   :  { %v515_v58 = vmul.f32 %v1116_v54, %v514_v55  ;;  %838 = vmatpush.msrb.mxu3 %v673_v50  ;;  %v654_v55 = vld [vmem:[#allocation8 + $0x80] sm:$0xff]  ;;  %v699_v50 = vld [vmem:[#allocation8 + $0x1e8] sm:$0xff] }
 0x1a1   :  { %778 = vmatpush.msrb.mxu0 %v670_v47  ;;  %v708_v47 = vld [vmem:[#allocation8 + $0x230] sm:$0xff] }
 0x1a2   :  { %v516_v61 = vmul.f32 0.5, %v515_v58  ;;  %v657_v58 = vld [vmem:[#allocation8 + $0x98] sm:$0xff] }
 0x1a3   :  { %779 = vmatpush.msrb.mxu0 %v662_v51  ;;  %v700_v51 = vld [vmem:[#allocation8 + $0x1f0] sm:$0xff] }
 0x1a4   :  { %v517_v62 = vsub.f32 1.5, %v516_v61  ;;  %v648_v61 = vld [vmem:[#allocation8 + $0x50] sm:$0xff] }
 0x1a5   :  { %780 = vmatpush.msrb.mxu0 %v654_v55  ;;  %v692_v55 = vld [vmem:[#allocation8 + $0x1b0] sm:$0xff] }
 0x1a6   :  { %v518_v63 = vmul.f32 %v1116_v54, %v517_v62  ;;  %v649_v62 = vld [vmem:[#allocation8 + $0x58] sm:$0xff] }
 0x1a7   :  { %781 = vmatpush.msrb.mxu0 %v646_v59  ;;  %v684_v59 = vld [vmem:[#allocation8 + $0x170] sm:$0xff] }
 0x1a8   :  { %v522_v0 = vsel %vm521_vm5, %v1116_v54, %v518_v63  ;;  %v665_v54 = vld [vmem:[#allocation8 + $0xd8] sm:$0xff]  ;;  %v638_v63 = vld [vmem:[#allocation8] sm:$0xff]  ;;  %vm1068_vm5 = vcmask 1040384  }
 0x1a9   :  { %v523_v1 = vmul.f32 %v522_v0, %v511_v40  ;;  %v687_v40 = vld [vmem:[#allocation8 + $0x188] sm:$0xff]  ;;  %839 = vmatpush.msrb.mxu3 %v665_v54  ;;  %782 = vmatpush.msrb.mxu0 %v638_v63 }
 0x1aa   :  { %v691_v54 = vld [vmem:[#allocation8 + $0x1a8] sm:$0xff] }
 0x1ab   :  { %1117 = vtanh.f32 %v523_v1  ;;  %840 = vmatpush.msrb.mxu3 %v657_v58  ;;  %v640_v1 = vld [vmem:[#allocation8 + $0x10] sm:$0xff]  ;;  %v683_v58 = vld [vmem:[#allocation8 + $0x168] sm:$0xff] }
 0x1ad   :  { %841 = vmatpush.msrb.mxu3 %v649_v62  ;;  %v675_v62 = vld [vmem:[#allocation8 + $0x128] sm:$0xff] }
 0x1b1   :  { %v1118_v2 = vpop.eup %1117 }
 0x1b2   :  { %v525_v3 = vmul.f32 %v1118_v2, %v522_v0  ;;  %v639_v0 = vld [vmem:[#allocation8 + $0x8] sm:$0xff]  ;;  %v641_v2 = vld [vmem:[#allocation8 + $0x18] sm:$0xff] }
 0x1b3   :  { %842 = vmatpush.msrb.mxu3 %v641_v2 }
 0x1b4   :  { %v526_v4 = vmul.f32 %v525_v3, %v500_v32  ;;  %v527_v5 = vmul.f32 %v525_v3, %v508_v33  ;;  %v703_v32 = vld [vmem:[#allocation8 + $0x208] sm:$0xff]  ;;  %v704_v33 = vld [vmem:[#allocation8 + $0x210] sm:$0xff]  ;;  %v762_v3 = vld [vmem:[#allocation8 + $0x3e0] sm:$0xff] }
 0x1b5   :  { %794 = vmatpush.msrb.mxu1 %v703_v32  ;;  %814 = vmatpush.msrb.mxu2 %v704_v33  ;;  %v733_v32 = vld [vmem:[#allocation8 + $0x2f8] sm:$0xff] }
 0x1b6   :  { %528 = vst [vmem:[#allocation2] sm:$0x1] %v526_v4  ;;  %v763_v4 = vld [vmem:[#allocation8 + $0x3e8] sm:$0xff]  ;;  %847 = vmatpush.msra.mxu0 %v762_v3 }
 0x1b7   :  { %529 = vst [vmem:[#allocation2 + $0x1] sm:$0x1] %v527_v5  ;;  %795 = vmatpush.msrb.mxu1 %v695_v36  ;;  %815 = vmatpush.msrb.mxu2 %v696_v37  ;;  %v603_v5 = vld [vmem:[%s1410_s6] sm:$0x3]  ;;  %v723_v36 = vld [vmem:[#allocation8 + $0x2a8] sm:$0xff]  ;;  %v724_v37 = vld [vmem:[#allocation8 + $0x2b0] sm:$0xff] }
 0x1b8   :  { %v614_v16 = vperm.slane %v603_v5, 1  ;;  %848 = vmatpush.msra.mxu0 %v754_v8  ;;  %v658_v8 = vld [vmem:[#allocation8 + $0xa0] sm:$0xff] }
 0x1b9   :  { %796 = vmatpush.msrb.mxu1 %v687_v40  ;;  %816 = vmatpush.msrb.mxu2 %v688_v41  ;;  %v714_v40 = vld [vmem:[#allocation8 + $0x260] sm:$0xff]  ;;  %v715_v41 = vld [vmem:[#allocation8 + $0x268] sm:$0xff] }
 0x1ba   :  { %849 = vmatpush.msra.mxu0 %v746_v17 }
 0x1bb   :  { %797 = vmatpush.msrb.mxu1 %v679_v44  ;;  %817 = vmatpush.msrb.mxu2 %v680_v45  ;;  %v706_v45 = vld [vmem:[#allocation8 + $0x220] sm:$0xff] }
 0x1bc   :  { %850 = vmatpush.msra.mxu0 %v738_v23 }
 0x1bd   :  { %798 = vmatpush.msrb.mxu1 %v671_v48  ;;  %818 = vmatpush.msrb.mxu2 %v672_v49  ;;  %v709_v48 = vld [vmem:[#allocation8 + $0x238] sm:$0xff]  ;;  %v698_v49 = vld [vmem:[#allocation8 + $0x1e0] sm:$0xff] }
 0x1be   :  { %v562_v6 = vld [vmem:[#allocation2] sm:$0x3]  ;;  %851 = vmatpush.msra.mxu0 %v730_v29 }
 0x1bf   :  { %579 = vmatmul.f32.vlgmr.msra.gmra.mxu2 %v562_v6  ;;  %599 = vmatmul.f32.vlgmr.msra.gmra.mxu3 %v562_v6  ;;  %v764_v6 = vld [vmem:[#allocation8 + $0x3f0] sm:$0xff] }
 0x1c0   :  { %799 = vmatpush.msrb.mxu1 %v663_v52  ;;  %819 = vmatpush.msrb.mxu2 %v664_v53  ;;  %v701_v52 = vld [vmem:[#allocation8 + $0x1f8] sm:$0xff]  ;;  %v690_v53 = vld [vmem:[#allocation8 + $0x1a0] sm:$0xff] }
 0x1c1   :  { %907 = vmatpush.msra.mxu3 %v765_v7  ;;  %852 = vmatpush.msra.mxu0 %v722_v35  ;;  %v669_v7 = vld [vmem:[#allocation8 + $0xf8] sm:$0xff] }
 0x1c2   :  { %800 = vmatpush.msrb.mxu1 %v655_v56  ;;  %820 = vmatpush.msrb.mxu2 %v656_v57  ;;  %v693_v56 = vld [vmem:[#allocation8 + $0x1b8] sm:$0xff]  ;;  %v682_v57 = vld [vmem:[#allocation8 + $0x160] sm:$0xff] }
 0x1c3   :  { %908 = vmatpush.msra.mxu3 %v757_v13  ;;  %853 = vmatpush.msra.mxu0 %v714_v40  ;;  %v650_v13 = vld [vmem:[#allocation8 + $0x60] sm:$0xff] }
 0x1c4   :  { %801 = vmatpush.msrb.mxu1 %v647_v60  ;;  %821 = vmatpush.msrb.mxu2 %v648_v61  ;;  %v685_v60 = vld [vmem:[#allocation8 + $0x178] sm:$0xff]  ;;  %v674_v61 = vld [vmem:[#allocation8 + $0x120] sm:$0xff] }
 0x1c5   :  { %909 = vmatpush.msra.mxu3 %v749_v20  ;;  %854 = vmatpush.msra.mxu0 %v706_v45  ;;  %v644_v20 = vld [vmem:[#allocation8 + $0x30] sm:$0xff] }
 0x1c6   :  { %802 = vmatpush.msrb.mxu1 %v639_v0  ;;  %822 = vmatpush.msrb.mxu2 %v640_v1  ;;  %v676_v0 = vld [vmem:[#allocation8 + $0x130] sm:$0xff]  ;;  %v677_v1 = vld [vmem:[#allocation8 + $0x138] sm:$0xff] }
 0x1c7   :  { %910 = vmatpush.msra.mxu3 %v741_v26  ;;  %855 = vmatpush.msra.mxu0 %v698_v49 }
 0x1c8   :  { %867 = vmatpush.msra.mxu1 %v763_v4  ;;  %887 = vmatpush.msra.mxu2 %v764_v6  ;;  %v666_v4 = vld [vmem:[#allocation8 + $0xe0] sm:$0xff]  ;;  %v668_v6 = vld [vmem:[#allocation8 + $0xf0] sm:$0xff] }
 0x1c9   :  { %911 = vmatpush.msra.mxu3 %v733_v32  ;;  %856 = vmatpush.msra.mxu0 %v690_v53 }
 0x1ca   :  { %868 = vmatpush.msra.mxu1 %v755_v9  ;;  %888 = vmatpush.msra.mxu2 %v756_v10  ;;  %v659_v9 = vld [vmem:[#allocation8 + $0xa8] sm:$0xff] }
 0x1cb   :  { %912 = vmatpush.msra.mxu3 %v725_v38  ;;  %857 = vmatpush.msra.mxu0 %v682_v57 }
 0x1cc   :  { %869 = vmatpush.msra.mxu1 %v747_v18  ;;  %889 = vmatpush.msra.mxu2 %v748_v19  ;;  %v642_v18 = vld [vmem:[#allocation8 + $0x20] sm:$0xff]  ;;  %v643_v19 = vld [vmem:[#allocation8 + $0x28] sm:$0xff] }
 0x1cd   :  { %913 = vmatpush.msra.mxu3 %v717_v43  ;;  %858 = vmatpush.msra.mxu0 %v674_v61 }
 0x1ce   :  { %870 = vmatpush.msra.mxu1 %v739_v24  ;;  %890 = vmatpush.msra.mxu2 %v740_v25 }
 0x1cf   :  { %914 = vmatpush.msra.mxu3 %v709_v48  ;;  %859 = vmatpush.msra.mxu0 %v666_v4 }
 0x1d0   :  { %871 = vmatpush.msra.mxu1 %v731_v30  ;;  %891 = vmatpush.msra.mxu2 %v732_v31 }
 0x1d1   :  { %915 = vmatpush.msra.mxu3 %v701_v52  ;;  %860 = vmatpush.msra.mxu0 %v658_v8 }
 0x1d2   :  { %872 = vmatpush.msra.mxu1 %v723_v36  ;;  %892 = vmatpush.msra.mxu2 %v724_v37 }
 0x1d3   :  { %916 = vmatpush.msra.mxu3 %v693_v56  ;;  %861 = vmatpush.msra.mxu0 %v650_v13 }
 0x1d4   :  { %873 = vmatpush.msra.mxu1 %v715_v41  ;;  %893 = vmatpush.msra.mxu2 %v716_v42 }
 0x1d5   :  { %917 = vmatpush.msra.mxu3 %v685_v60  ;;  %862 = vmatpush.msra.mxu0 %v642_v18 }
 0x1d6   :  { %874 = vmatpush.msra.mxu1 %v707_v46  ;;  %894 = vmatpush.msra.mxu2 %v708_v47 }
 0x1d7   :  { %918 = vmatpush.msra.mxu3 %v677_v1 }
 0x1d8   :  { %875 = vmatpush.msra.mxu1 %v699_v50  ;;  %895 = vmatpush.msra.mxu2 %v700_v51 }
 0x1d9   :  { %919 = vmatpush.msra.mxu3 %v669_v7 }
 0x1da   :  { %876 = vmatpush.msra.mxu1 %v691_v54  ;;  %896 = vmatpush.msra.mxu2 %v692_v55 }
 0x1dc   :  { %877 = vmatpush.msra.mxu1 %v683_v58  ;;  %897 = vmatpush.msra.mxu2 %v684_v59 }
 0x1de   :  { %878 = vmatpush.msra.mxu1 %v675_v62  ;;  %898 = vmatpush.msra.mxu2 %v676_v0 }
 0x1e0   :  { %899 = vmatpush.msra.mxu2 %v668_v6 }
 0x242   :  { %v580_v11 = vpop.f32.mrf.mxu2  ;;  %v600_v12 = vpop.f32.mrf.mxu3 }
 0x243   :  { %v610_v14 = vrot.slane %v580_v11, 1  ;;  %v605_v15 = vrot.slane %v600_v12, 1 }
 0x245   :  { %v607_v21 = vsub.f32 %v580_v11, %v605_v15  ;;  %v612_v22 = vadd.f32 %v610_v14, %v600_v12  ;;  %v660_v11 = vld [vmem:[#allocation8 + $0xb0] sm:$0xff]  ;;  %v661_v12 = vld [vmem:[#allocation8 + $0xb8] sm:$0xff]  ;;  %v651_v14 = vld [vmem:[#allocation8 + $0x68] sm:$0xff] }
 0x246   :  { %v652_v15 = vld [vmem:[#allocation8 + $0x70] sm:$0xff]  ;;  %900 = vmatpush.msra.mxu2 %v660_v11  ;;  %920 = vmatpush.msra.mxu3 %v661_v12 }
 0x247   :  { %v1334_v27 = vadd.f32 %v607_v21, %v603_v5  ;;  %v1336_v28 = vadd.f32 %v614_v16, %v612_v22  ;;  %v667_v5 = vld [vmem:[#allocation8 + $0xe8] sm:$0xff]  ;;  %v653_v16 = vld [vmem:[#allocation8 + $0x78] sm:$0xff] }
 0x248   :  { %879 = vmatpush.msra.mxu1 %v667_v5  ;;  %v645_v21 = vld [vmem:[#allocation8 + $0x38] sm:$0xff]  ;;  %901 = vmatpush.msra.mxu2 %v652_v15 }
 0x249   :  { %v617_v33 = vmul.f32 %v1334_v27, %v1334_v27  ;;  %v618_v34 = vmul.f32 %v1336_v28, %v1336_v28  ;;  %921 = vmatpush.msra.mxu3 %v653_v16 }
 0x24a   :  { %880 = vmatpush.msra.mxu1 %v659_v9  ;;  %902 = vmatpush.msra.mxu2 %v644_v20 }
 0x24b   :  { %v1342_v39 = vadd.f32 %v618_v34, %v617_v33  ;;  %922 = vmatpush.msra.mxu3 %v645_v21  ;;  %v927_v34 = vld [vmem:[%s1412_s8] sm:$0xff] }
 0x24c   :  { %881 = vmatpush.msra.mxu1 %v651_v14  ;;  %v973_v37 = vperm.slane %v927_v34, 4  ;;  %v974_v38 = vperm.slane %v927_v34, 5  ;;  %v945_v40 = vperm.slane %v927_v34, 0  ;;  %v946_v42 = vperm.slane %v927_v34, 1 }
 0x24d   :  { %v1345_v44 = vmax.f32 %v1342_v39, 1e-30  ;;  %v975_v53 = vperm.slane %v927_v34, 6  ;;  %v976_v54 = vperm.slane %v927_v34, 7  ;;  %v947_v57 = vperm.slane %v927_v34, 2 }
 0x24e   :  { %882 = vmatpush.msra.mxu1 %v643_v19  ;;  %v948_v58 = vperm.slane %v927_v34, 3 }
 0x24f   :  { %1119 = vrsqrt.f32 %v1345_v44  ;;  %vm627_vm7 = vweird.f32 %v1345_v44 }
 0x255   :  { %v1120_v63 = vpop.eup %1119 }
 0x256   :  { %v622_v2 = vmul.f32 %v1120_v63, %v1345_v44  ;;  %vm628_vm6 = vweird.f32 %v1120_v63 }
 0x257   :  { %vm629_vm8 = vmor %vm627_vm7, %vm628_vm6  ;;  %vm1070_vm6 = vcmask 1042434   ;;  %vm1072_vm7 = vcmask 1041408  }
 0x258   :  { %v623_v3 = vmul.f32 %v1120_v63, %v622_v2 }
 0x25a   :  { %v624_v10 = vmul.f32 0.5, %v623_v3 }
 0x25c   :  { %v625_v17 = vsub.f32 1.5, %v624_v10 }
 0x25e   :  { %v626_v22 = vmul.f32 %v1120_v63, %v625_v17 }
 0x260   :  { %v630_v23 = vsel %vm629_vm8, %v1120_v63, %v626_v22 }
 0x261   :  { %v631_v24 = vmul.f32 %v630_v23, %v1342_v39 }
 0x263   :  { %1121 = vtanh.f32 %v631_v24 }
 0x269   :  { %v1122_v25 = vpop.eup %1121 }
 0x26a   :  { %v633_v26 = vmul.f32 %v1122_v25, %v630_v23 }
 0x26c   :  { %v634_v29 = vmul.f32 %v633_v26, %v1334_v27  ;;  %v635_v30 = vmul.f32 %v633_v26, %v1336_v28 }
 0x26e   :  { %636 = vst [vmem:[#allocation2] sm:$0x1] %v634_v29 }
 0x26f   :  { %637 = vst [vmem:[#allocation2 + $0x1] sm:$0x1] %v635_v30 }
 0x276   :  { %v766_v31 = vld [vmem:[#allocation2] sm:$0x3] }
 0x277   :  { %783 = vmatmul.f32.vlgmr.msrb.gmra.mxu0 %v766_v31  ;;  %803 = vmatmul.f32.vlgmr.msrb.gmra.mxu1 %v766_v31 }
 0x278   :  { %823 = vmatmul.f32.vlgmr.msrb.gmra.mxu2 %v766_v31  ;;  %843 = vmatmul.f32.vlgmr.msrb.gmra.mxu3 %v766_v31 }
 0x27f   :  { %863 = vmatmul.f32.vlgmr.msra.gmra.mxu0 %v766_v31  ;;  %883 = vmatmul.f32.vlgmr.msra.gmra.mxu1 %v766_v31 }
 0x280   :  { %903 = vmatmul.f32.vlgmr.msra.gmra.mxu2 %v766_v31  ;;  %923 = vmatmul.f32.vlgmr.msra.gmra.mxu3 %v766_v31 }
 0x2f4   :  { %v784_v32 = vpop.f32.mrf.mxu0  ;;  %v804_v33 = vpop.f32.mrf.mxu1 }
 0x2f5   :  { %v961_v27 = vrot.slane %v784_v32, 1  ;;  %v962_v35 = vrot.slane %v804_v33, 1 }
 0x2fb   :  { %v824_v28 = vpop.f32.mrf.mxu2  ;;  %v844_v36 = vpop.f32.mrf.mxu3 }
 0x2fc   :  { %v864_v39 = vpop.f32.mrf.mxu0  ;;  %v884_v41 = vpop.f32.mrf.mxu1  ;;  %v963_v55 = vrot.slane %v824_v28, 1  ;;  %v964_v56 = vrot.slane %v844_v36, 1 }
 0x2fd   :  { %v932_v43 = vrot.slane %v864_v39, 1  ;;  %v969_v44 = vadd.f32 %v961_v27, %v864_v39  ;;  %v933_v45 = vrot.slane %v884_v41, 1  ;;  %v970_v46 = vadd.f32 %v962_v35, %v884_v41 }
 0x2ff   :  { %v940_v47 = vsub.f32 %v784_v32, %v932_v43  ;;  %v1356_v48 = vadd.f32 %v973_v37, %v969_v44  ;;  %v941_v49 = vsub.f32 %v804_v33, %v933_v45  ;;  %v1358_v50 = vadd.f32 %v974_v38, %v970_v46 }
 0x301   :  { %v1360_v51 = vadd.f32 %v945_v40, %v940_v47  ;;  %v1362_v52 = vadd.f32 %v946_v42, %v941_v49  ;;  %v989_v60 = vmul.f32 %v1356_v48, %v1356_v48  ;;  %v990_v62 = vmul.f32 %v1358_v50, %v1358_v50 }
 0x303   :  { %v985_v59 = vmul.f32 %v1360_v51, %v1360_v51  ;;  %v986_v61 = vmul.f32 %v1362_v52, %v1362_v52  ;;  %v904_v63 = vpop.f32.mrf.mxu2  ;;  %v924_v0 = vpop.f32.mrf.mxu3 }
 0x304   :  { %v934_v1 = vrot.slane %v904_v63, 1  ;;  %v971_v2 = vadd.f32 %v963_v55, %v904_v63  ;;  %v935_v3 = vrot.slane %v924_v0, 1  ;;  %v972_v4 = vadd.f32 %v964_v56, %v924_v0 }
 0x305   :  { %v993_v5 = vadd.f32 %v989_v60, %v985_v59  ;;  %v994_v6 = vadd.f32 %v990_v62, %v986_v61 }
 0x306   :  { %v942_v7 = vsub.f32 %v824_v28, %v934_v1  ;;  %v1372_v8 = vadd.f32 %v975_v53, %v971_v2  ;;  %v943_v9 = vsub.f32 %v844_v36, %v935_v3  ;;  %v1374_v10 = vadd.f32 %v976_v54, %v972_v4 }
 0x307   :  { %v997_v11 = vmax.f32 %v993_v5, 1e-30  ;;  %v998_v12 = vmax.f32 %v994_v6, 1e-30 }
 0x308   :  { %v1376_v13 = vadd.f32 %v947_v57, %v942_v7  ;;  %v1378_v14 = vadd.f32 %v948_v58, %v943_v9  ;;  %v991_v15 = vmul.f32 %v1372_v8, %v1372_v8  ;;  %v992_v18 = vmul.f32 %v1374_v10, %v1374_v10 }
 0x309   :  { %1123 = vrsqrt.f32 %v997_v11  ;;  %vm1017_vm11 = vweird.f32 %v998_v12  ;;  %vm1007_vm12 = vweird.f32 %v997_v11  ;;  %v1075_v7 = vlaneseq }
 0x30a   :  { %1125 = vrsqrt.f32 %v998_v12  ;;  %v987_v16 = vmul.f32 %v1376_v13, %v1376_v13  ;;  %v988_v17 = vmul.f32 %v1378_v14, %v1378_v14 }
 0x30b   :  { %vm1077_vm8 = vcmp.lt.s32.totalorder %v1075_v7, 512 }
 0x30c   :  { %v995_v19 = vadd.f32 %v991_v15, %v987_v16  ;;  %v996_v20 = vadd.f32 %v992_v18, %v988_v17 }
 0x30e   :  { %v999_v21 = vmax.f32 %v995_v19, 1e-30  ;;  %v1000_v22 = vmax.f32 %v996_v20, 1e-30 }
 0x30f   :  { %v1124_v23 = vpop.eup %1123 }
 0x310   :  { %v1126_v24 = vpop.eup %1125  ;;  %v1002_v25 = vmul.f32 %v1124_v23, %v997_v11  ;;  %1127 = vrsqrt.f32 %v999_v21  ;;  %vm1008_vm10 = vweird.f32 %v1124_v23  ;;  %vm1027_vm1 = vweird.f32 %v999_v21 }
 0x311   :  { %v1012_v26 = vmul.f32 %v1126_v24, %v998_v12  ;;  %1129 = vrsqrt.f32 %v1000_v22  ;;  %vm1018_vm9 = vweird.f32 %v1126_v24  ;;  %vm1009_vm14 = vmor %vm1007_vm12, %vm1008_vm10  ;;  %vm1037_vm3 = vweird.f32 %v1000_v22 }
 0x312   :  { %v1003_v29 = vmul.f32 %v1124_v23, %v1002_v25  ;;  %vm1019_vm13 = vmor %vm1017_vm11, %vm1018_vm9 }
 0x313   :  { %v1013_v30 = vmul.f32 %v1126_v24, %v1012_v26 }
 0x314   :  { %v1004_v31 = vmul.f32 0.5, %v1003_v29 }
 0x315   :  { %v1014_v32 = vmul.f32 0.5, %v1013_v30 }
 0x316   :  { %v1128_v33 = vpop.eup %1127  ;;  %v1005_v34 = vsub.f32 1.5, %v1004_v31 }
 0x317   :  { %v1130_v27 = vpop.eup %1129  ;;  %v1015_v35 = vsub.f32 1.5, %v1014_v32  ;;  %v1022_v28 = vmul.f32 %v1128_v33, %v999_v21  ;;  %vm1028_vm15 = vweird.f32 %v1128_v33 }
 0x318   :  { %v1006_v36 = vmul.f32 %v1124_v23, %v1005_v34  ;;  %v1032_v37 = vmul.f32 %v1130_v27, %v1000_v22  ;;  %vm1038_vm0 = vweird.f32 %v1130_v27  ;;  %vm1029_vm2 = vmor %vm1027_vm1, %vm1028_vm15 }
 0x319   :  { %v1016_v38 = vmul.f32 %v1126_v24, %v1015_v35  ;;  %v1023_v39 = vmul.f32 %v1128_v33, %v1022_v28  ;;  %vm1039_vm4 = vmor %vm1037_vm3, %vm1038_vm0 }
 0x31a   :  { %v1033_v40 = vmul.f32 %v1130_v27, %v1032_v37  ;;  %v1010_v43 = vsel %vm1009_vm14, %v1124_v23, %v1006_v36 }
 0x31b   :  { %v1020_v41 = vsel %vm1019_vm13, %v1126_v24, %v1016_v38  ;;  %v1024_v42 = vmul.f32 0.5, %v1023_v39  ;;  %v1041_v49 = vmul.f32 %v1010_v43, %v993_v5 }
 0x31c   :  { %v1042_v44 = vmul.f32 %v1020_v41, %v994_v6  ;;  %v1034_v45 = vmul.f32 0.5, %v1033_v40 }
 0x31d   :  { %v1025_v46 = vsub.f32 1.5, %v1024_v42 }
 0x31e   :  { %1131 = vtanh.f32 %v1042_v44  ;;  %v1035_v47 = vsub.f32 1.5, %v1034_v45 }
 0x31f   :  { %v1026_v53 = vmul.f32 %v1128_v33, %v1025_v46  ;;  %1133 = vtanh.f32 %v1041_v49 }
 0x320   :  { %v1036_v54 = vmul.f32 %v1130_v27, %v1035_v47 }
 0x321   :  { %v1030_v55 = vsel %vm1029_vm2, %v1128_v33, %v1026_v53 }
 0x322   :  { %v1043_v56 = vmul.f32 %v1030_v55, %v995_v19  ;;  %v1040_v57 = vsel %vm1039_vm4, %v1130_v27, %v1036_v54 }
 0x323   :  { %v1044_v58 = vmul.f32 %v1040_v57, %v996_v20 }
 0x324   :  { %v1132_v59 = vpop.eup %1131  ;;  %1135 = vtanh.f32 %v1043_v56 }
 0x325   :  { %1137 = vtanh.f32 %v1044_v58  ;;  %v1050_v60 = vmul.f32 %v1132_v59, %v1020_v41  ;;  %v1134_v61 = vpop.eup %1133 }
 0x326   :  { %v1049_v3 = vmul.f32 %v1134_v61, %v1010_v43 }
 0x327   :  { %v1054_v63 = vmul.f32 %v1050_v60, %v1362_v52  ;;  %v1058_v0 = vmul.f32 %v1050_v60, %v1358_v50 }
 0x328   :  { %v1053_v50 = vmul.f32 %v1049_v3, %v1360_v51  ;;  %v1057_v17 = vmul.f32 %v1049_v3, %v1356_v48 }
 0x329   :  { %v1065_v9 = vrot.slane %v1054_v63, 7  ;;  %v1084_v11 = vrot.slane %v1058_v0, 7 }
 0x32a   :  { %v1136_v62 = vpop.eup %1135 }
 0x32b   :  { %v1138_v1 = vpop.eup %1137  ;;  %v1051_v2 = vmul.f32 %v1136_v62, %v1030_v55 }
 0x32c   :  { %v1052_v4 = vmul.f32 %v1138_v1, %v1040_v57 }
 0x32d   :  { %v1055_v5 = vmul.f32 %v1051_v2, %v1376_v13  ;;  %v1059_v6 = vmul.f32 %v1051_v2, %v1372_v8  ;;  %v1069_v8 = vsel %vm1068_vm5, %v1053_v50, %v1065_v9  ;;  %v1087_v13 = vsel %vm1068_vm5, %v1057_v17, %v1084_v11 }
 0x32e   :  { %v1056_v12 = vmul.f32 %v1052_v4, %v1378_v14  ;;  %v1060_v15 = vmul.f32 %v1052_v4, %v1374_v10 }
 0x32f   :  { %v1066_v16 = vrot.slane %v1055_v5, 6  ;;  %v1085_v52 = vrot.slane %v1059_v6, 6 }
 0x330   :  { %v1067_v18 = vrot.slane %v1056_v12, 5  ;;  %v1086_v19 = vrot.slane %v1060_v15, 5 }
 0x332   :  { %v1071_v20 = vsel %vm1070_vm6, %v1066_v16, %v1067_v18  ;;  %v1088_v21 = vsel %vm1070_vm6, %v1085_v52, %v1086_v19 }
 0x333   :  { %v1073_v14 = vsel %vm1072_vm7, %v1069_v8, %v1071_v20  ;;  %v1089_v22 = vsel %vm1072_vm7, %v1087_v13, %v1088_v21 }
 0x334   :  { %1079 = vst.msk [vmem:[%s1413_s9] sm:$0xf] %vm1077_vm8, %v1073_v14 }
 0x335   :  { %1091 = vst.msk [vmem:[%s1414_s10] sm:$0xf] %vm1077_vm8, %v1089_v22 }
 0x336   :  { %1100 = vsyncpa [#allocation4], 1 }
 0x337   :  { %1101 = vsyncpa [#allocation6], 1 }
 0x338   :  { %1102 = vsyncpa [#allocation9], 1 }

</bundles_post_ra>
